<compile_context>
chip_gen: v7x
topology: tpu7x:2x2x1
jax: 0.10.0
libtpu: 0.0.40
codegen_flags: <defaults>
</compile_context>

<pallas_src>
import jax
import jax.numpy as jnp
from jax.experimental import pallas as pl
from jax.experimental.pallas import tpu as pltpu


def videoencoder_kernel(b1_ref, x_ref, w1_ref, w2t_ref, b2_ref, o_ref):
    # b1_ref:  (1,)       SMEM (scalar prefetch)   nn.Linear(T, 1).bias
    # x_ref:   (TB, T, F) VMEM                     input tile
    # w1_ref:  (1, T, 1)  VMEM (resident)          nn.Linear(T, 1).weight
    # w2t_ref: (F, F)     VMEM (resident)          proj weight, (F_in, F_out)
    # b2_ref:  (1, F)     VMEM (resident)          proj bias
    # o_ref:   (TB, F)    VMEM                     output tile

    # Time-weighted reduction in one full-block pass (VPU multiply + sublane
    # reduce): y[b, f] = sum_t x[b, t, f] * w1[t] + b1.  f32 accumulation.
    prod = x_ref[...].astype(jnp.float32) * w1_ref[...]        # (TB, T, F) f32
    y = jnp.sum(prod, axis=1) + b1_ref[0]                      # (TB, F)   f32

    # Projection on the MXU: out = y @ W2^T + b2.  Operands in the weight's
    # native (reduced) dtype, f32 accumulate.
    out = jnp.dot(y.astype(w2t_ref.dtype), w2t_ref[...],
                  preferred_element_type=jnp.float32)           # (TB, F) f32
    out = out + b2_ref[...].astype(jnp.float32)                 # broadcast (1, F)
    o_ref[...] = out.astype(o_ref.dtype)


def _vmem_capacity_bytes():
    try:
        return int(pltpu.get_tpu_info().vmem_capacity_bytes)
    except Exception:
        # Conservative fallback = v7x per-TensorCore VMEM; safe on all gens.
        return 64 * 1024 * 1024


def _choose_batch_tile(B, T, F, x_itemsize, out_itemsize, vmem_budget):
    """Largest sublane-aligned batch tile that fits the VMEM budget."""
    # Resident operands (constant index_map; assume they are still 2x buffered).
    resident = 2 * (F * F + F) * x_itemsize + 2 * T * 4
    # Per batch-row cost: double-buffered x tile + double-buffered out tile
    # + f32 (T, F) product temporary for the time reduction.
    per_row = 2 * T * F * x_itemsize + 2 * F * out_itemsize + T * F * 4
    tb_cap = (vmem_budget - resident) // per_row
    tb_cap = int(max(8, min(tb_cap, 1024)))
    tb_cap = (tb_cap // 8) * 8

    if B <= 16:
        # Tiny batch: one block (block == full dim, so no (8,128) issue).
        return min(B, tb_cap)

    # Ensure the "parallel" batch axis has >= 2 blocks (v7x megacore).
    half = ((B + 1) // 2 + 7) // 8 * 8
    tb = min(tb_cap, half)
    return max(8, (tb // 8) * 8)


def video_encoder_dino(x, w1, b1, w2t, b2):
    """VideoEncoderDino forward.

    x:   (B, T, F)   activations — bf16 recommended (f32 also works)
    w1:  (1, T)      nn.Linear(T, 1).weight  (kept f32; tiny)
    b1:  (1,)        nn.Linear(T, 1).bias
    w2t: (F, F)      nn.Linear(768, 768).weight pre-transposed ONCE at model
                     load time to (F_in, F_out); bf16 recommended
    b2:  (F,)        nn.Linear(768, 768).bias, same dtype as w2t
    """
    B, T, F = x.shape
    x_itemsize = jnp.dtype(x.dtype).itemsize
    out_itemsize = x_itemsize                      # output in the same reduced dtype

    vmem_cap = _vmem_capacity_bytes()
    vmem_budget = int(vmem_cap * 0.70)
    vmem_limit = int(vmem_cap * 0.80)

    tb = _choose_batch_tile(B, T, F, x_itemsize, out_itemsize, vmem_budget)
    num_blocks = pl.cdiv(B, tb)     # ragged B: last partial block masked on store

    # Small operands.
    w1_vmem = jnp.asarray(w1, jnp.float32).reshape(1, T, 1)   # resident VMEM
    b1_smem = jnp.asarray(b1, jnp.float32).reshape(-1)        # scalar prefetch (1,)
    b2_2d = b2.reshape(1, F)

    grid_spec = pltpu.PrefetchScalarGridSpec(
        num_scalar_prefetch=1,
        grid=(num_blocks,),
        in_specs=[
            pl.BlockSpec((tb, T, F), lambda i, b1s: (i, 0, 0)),   # x tile
            pl.BlockSpec((1, T, 1), lambda i, b1s: (0, 0, 0)),    # w1 resident
            pl.BlockSpec((F, F), lambda i, b1s: (0, 0)),          # W2^T resident
            pl.BlockSpec((1, F), lambda i, b1s: (0, 0)),          # b2 resident
        ],
        out_specs=pl.BlockSpec((tb, F), lambda i, b1s: (i, 0)),
    )

    cost = pl.CostEstimate(
        flops=2 * B * F * (T + F),
        transcendentals=0,
        bytes_accessed=int(
            x.size * x_itemsize
            + w2t.size * jnp.dtype(w2t.dtype).itemsize
            + b2.size * jnp.dtype(b2.dtype).itemsize
            + w1_vmem.size * 4 + 4
            + B * F * out_itemsize),
    )

    return pl.pallas_call(
        videoencoder_kernel,
        out_shape=jax.ShapeDtypeStruct((B, F), x.dtype),
        grid_spec=grid_spec,
        compiler_params=pltpu.CompilerParams(
            dimension_semantics=("parallel",),     # megacore-shard batch on v7x
            vmem_limit_bytes=vmem_limit,
        ),
        cost_estimate=cost,
    )(b1_smem, x, w1_vmem, w2t, b2_2d)


def reference(x, w1, b1, w2, b2):
    # Pure-JAX mirror of the PyTorch forward (w2 in PyTorch (out, in) layout).
    xp = jnp.transpose(x, (0, 2, 1))                 # (B, F, T)
    y = jnp.einsum("bft,ot->bfo", xp, w1) + b1       # (B, F, 1)
    y = jnp.squeeze(y, -1)                           # (B, F)
    return jnp.einsum("bf,of->bo", y, w2) + b2       # (B, F)


if __name__ == "__main__":
    B, T, F = 2, 8, 768   # input_dim = T = 8, feature dim fixed at 768 by proj

    key = jax.random.PRNGKey(0)
    kx, k1w, k1b, k2w, k2b = jax.random.split(key, 5)

    x_f32 = jax.random.normal(kx, (B, T, F), dtype=jnp.float32)

    # Deterministic PyTorch-style uniform(-1/sqrt(fan_in), 1/sqrt(fan_in)) init.
    bnd1 = 1.0 / jnp.sqrt(jnp.float32(T))
    w1 = jax.random.uniform(k1w, (1, T), jnp.float32, -bnd1, bnd1)
    b1 = jax.random.uniform(k1b, (1,), jnp.float32, -bnd1, bnd1)

    bnd2 = 1.0 / jnp.sqrt(jnp.float32(F))
    w2 = jax.random.uniform(k2w, (F, F), jnp.float32, -bnd2, bnd2)
    b2 = jax.random.uniform(k2b, (F,), jnp.float32, -bnd2, bnd2)

    # One-time model-load-time transforms (not paid per forward call):
    #   * activations and projection params carried in bf16 (halves the HBM
    #     stream; f32 accumulation stays in-kernel)
    #   * proj weight pre-transposed to (F_in, F_out)
    x_bf16 = x_f32.astype(jnp.bfloat16)
    w2t_bf16 = jnp.asarray(w2.T).astype(jnp.bfloat16)
    b2_bf16 = b2.astype(jnp.bfloat16)

    out = video_encoder_dino(x_bf16, w1, b1, w2t_bf16, b2_bf16)
    out = jax.block_until_ready(out)

    # Reference uses the same bf16-rounded inputs (upcast to f32) so the only
    # remaining delta is the in-kernel bf16 MXU feed with f32 accumulation.
    ref = reference(x_bf16.astype(jnp.float32), w1, b1,
                    jnp.asarray(w2t_bf16, jnp.float32).T,
                    b2_bf16.astype(jnp.float32))

    assert out.shape == (B, F)
    err = float(jnp.max(jnp.abs(out.astype(jnp.float32) - ref)))
    assert err < 2e-2, f"max err {err}"

    print("KERNEL_OK")
</pallas_src>

<mosaic_0001>
module attributes {stable_mosaic.version = 11 : i64} {
  func.func @videoencoder_kernel(%arg0: i32, %arg1: memref<1xf32, #tpu.memory_space<smem>>, %arg2: memref<2x8x768xbf16, #tpu.memory_space<vmem>>, %arg3: memref<1x8x1xf32, #tpu.memory_space<vmem>>, %arg4: memref<768x768xbf16, #tpu.memory_space<vmem>>, %arg5: memref<1x768xbf16, #tpu.memory_space<vmem>>, %arg6: memref<2x768xbf16, #tpu.memory_space<vmem>>) attributes {dimension_semantics = [#tpu.dimension_semantics<parallel>], iteration_bounds = array<i64: 1>, scalar_prefetch = 1 : i64, scratch_operands = 0 : i64, tpu.core_type = #tpu.core_type<tc>, window_params = [{transform_indices = @transform_0, window_bounds = array<i64: 2, 8, 768>}, {pipeline_mode = #tpu.pipeline_mode<synchronous>, transform_indices = @transform_1, window_bounds = array<i64: 1, 8, 1>}, {pipeline_mode = #tpu.pipeline_mode<synchronous>, transform_indices = @transform_2, window_bounds = array<i64: 768, 768>}, {pipeline_mode = #tpu.pipeline_mode<synchronous>, transform_indices = @transform_3, window_bounds = array<i64: 1, 768>}, {transform_indices = @transform_4, window_bounds = array<i64: 2, 768>}]} {
    %c0 = arith.constant 0 : index
    %c0_0 = arith.constant 0 : index
    %c0_1 = arith.constant 0 : index
    %0 = vector.load %arg2[%c0, %c0_0, %c0_1] : memref<2x8x768xbf16, #tpu.memory_space<vmem>>, vector<2x8x768xbf16>
    %1 = arith.extf %0 : vector<2x8x768xbf16> to vector<2x8x768xf32>
    %c0_2 = arith.constant 0 : index
    %c0_3 = arith.constant 0 : index
    %c0_4 = arith.constant 0 : index
    %2 = vector.load %arg3[%c0_2, %c0_3, %c0_4] : memref<1x8x1xf32, #tpu.memory_space<vmem>>, vector<1x8x1xf32>
    %3 = vector.broadcast %2 : vector<1x8x1xf32> to vector<2x8x768xf32>
    %4 = arith.mulf %1, %3 : vector<2x8x768xf32>
    %cst = arith.constant dense<0.000000e+00> : vector<2x768xf32>
    %5 = vector.multi_reduction <add>, %4, %cst [1] : vector<2x8x768xf32> to vector<2x768xf32>
    %c0_5 = arith.constant 0 : index
    %6 = memref.load %arg1[%c0_5] : memref<1xf32, #tpu.memory_space<smem>>
    %7 = vector.broadcast %6 : f32 to vector<2x768xf32>
    %8 = arith.addf %5, %7 : vector<2x768xf32>
    %9 = arith.truncf %8 : vector<2x768xf32> to vector<2x768xbf16>
    %c0_6 = arith.constant 0 : index
    %c0_7 = arith.constant 0 : index
    %10 = vector.load %arg4[%c0_6, %c0_7] : memref<768x768xbf16, #tpu.memory_space<vmem>>, vector<768x768xbf16>
    %cst_8 = arith.constant dense<0.000000e+00> : vector<2x768xf32>
    %11 = tpu.matmul %9, %10, %cst_8 {dimension_numbers = #tpu.dot_dimension_numbers<[1], [0], [0], [1], [0, 0, 1, 1], [], []>} : vector<2x768xbf16>, vector<768x768xbf16>, vector<2x768xf32> -> vector<2x768xf32>
    %c0_9 = arith.constant 0 : index
    %c0_10 = arith.constant 0 : index
    %12 = vector.load %arg5[%c0_9, %c0_10] : memref<1x768xbf16, #tpu.memory_space<vmem>>, vector<1x768xbf16>
    %13 = arith.extf %12 : vector<1x768xbf16> to vector<1x768xf32>
    %14 = vector.broadcast %13 : vector<1x768xf32> to vector<2x768xf32>
    %15 = arith.addf %11, %14 : vector<2x768xf32>
    %16 = arith.truncf %15 : vector<2x768xf32> to vector<2x768xbf16>
    %c0_11 = arith.constant 0 : index
    %c0_12 = arith.constant 0 : index
    %17 = vector.load %arg6[%c0_11, %c0_12] : memref<2x768xbf16, #tpu.memory_space<vmem>>, vector<2x768xbf16>
    tpu.vector_store %arg6[%c0_11, %c0_12], %16 {strides = array<i32>} : memref<2x768xbf16, #tpu.memory_space<vmem>>, vector<2x768xbf16>,
    return
  }
  func.func @transform_0(%arg0: i32, %arg1: memref<1xf32, #tpu.memory_space<smem>>) -> (i32, i32, i32) {
    %c0_i32 = arith.constant 0 : i32
    %c0_i32_0 = arith.constant 0 : i32
    %c0_i32_1 = arith.constant 0 : i32
    return %arg0, %c0_i32, %c0_i32_0 : i32, i32, i32
  }
  func.func @transform_1(%arg0: i32, %arg1: memref<1xf32, #tpu.memory_space<smem>>) -> (i32, i32, i32) {
    %c0_i32 = arith.constant 0 : i32
    %c0_i32_0 = arith.constant 0 : i32
    %c0_i32_1 = arith.constant 0 : i32
    %c0_i32_2 = arith.constant 0 : i32
    return %c0_i32, %c0_i32_0, %c0_i32_1 : i32, i32, i32
  }
  func.func @transform_2(%arg0: i32, %arg1: memref<1xf32, #tpu.memory_space<smem>>) -> (i32, i32) {
    %c0_i32 = arith.constant 0 : i32
    %c0_i32_0 = arith.constant 0 : i32
    %c0_i32_1 = arith.constant 0 : i32
    return %c0_i32, %c0_i32_0 : i32, i32
  }
  func.func @transform_3(%arg0: i32, %arg1: memref<1xf32, #tpu.memory_space<smem>>) -> (i32, i32) {
    %c0_i32 = arith.constant 0 : i32
    %c0_i32_0 = arith.constant 0 : i32
    %c0_i32_1 = arith.constant 0 : i32
    return %c0_i32, %c0_i32_0 : i32, i32
  }
  func.func @transform_4(%arg0: i32, %arg1: memref<1xf32, #tpu.memory_space<smem>>) -> (i32, i32) {
    %c0_i32 = arith.constant 0 : i32
    %c0_i32_0 = arith.constant 0 : i32
    return %arg0, %c0_i32 : i32, i32
  }
}

</mosaic_0001>

<bundles_post_ra>
// kernel: tpu_custom_call.1
= control target key start
LH: loop header
LB: loop body
LE: loop exit
PB: predicated region body
PF: predicated region fallthrough
CT: control target
= control target key end

     0   :  { %11 = vsyncpa [#allocation5], 0  ;;  %s3499_s0 = inlined_call_operand.<no memory space> [shape: f32[1], index: 0, kind: input, shape index: {}]   ;;  %s3500_s1 = inlined_call_operand.hbm [shape: bf16[2,8,768], index: 1, kind: input, shape index: {}]   ;;  %s3501_s2 = inlined_call_operand.vmem [shape: f32[1,8,1], index: 2, kind: input, shape index: {}]   ;;  %s3502_s3 = inlined_call_operand.hbm [shape: bf16[768,768], index: 3, kind: input, shape index: {}]   ;;  %s3503_s4 = inlined_call_operand.hbm [shape: bf16[1,768], index: 4, kind: input, shape index: {}]   ;;  %s3504_s5 = inlined_call_operand.hbm [shape: bf16[2,768], index: 5, kind: output, shape index: {}]  }
   0x1   :  { %12 = vsyncpa [#allocation8], 0 }
   0x2   :  { %13 = vsyncpa [#allocation6], 0  ;;  %s3316_s18 = smov [#allocation7]   ;;  %s3317_s20 = smov [#allocation4]  }
   0x3   :  { %s33_s19 = sshll.u32 %s3316_s18, 4  ;;  %s19_s21 = sshll.u32 %s3317_s20, 4  ;;  %s34_s19 = int_to_ptr.vmem [resolvable:$true] %s33_s19  ;;  %s3354_s21 = int_to_ptr.vmem [resolvable:$true] %s19_s21 }
   0x4   :  { %s3222_s24 = scalar_lea.hbm %s3502_s3, 36864 }
   0x5   :  { %p3223_p0 = scmp.ne.s32.totalorder %s3502_s3, %s3222_s24  ;;  %p3226_p1 = scmp.lt.u32.totalorder %s3222_s24, %s3502_s3 }
   0x7   :  { %p3228_p2 = pnand %p3226_p1, %p3223_p0 }
   0x9   :  { %3231 = shalt.err (!%p3228_p2)
}
   0xa   :  { %s3232_s29 = scalar_lea.vmem %s34_s19, 36864  ;;  %p3237_p4 = scmp.lt.s32.totalorder %s34_s19, %s34_s19 }
   0xb   :  { %p3233_p3 = scmp.ne.s32.totalorder %s34_s19, %s3232_s29  ;;  %p3238_p5 = scmp.lt.s32.totalorder %s3232_s29, %s3232_s29 }
   0xd   :  { %p3239_p6 = por %p3238_p5, %p3237_p4 }
   0xf   :  { %p3240_p7 = pnand %p3239_p6, %p3233_p3 }
  0x11   :  { %3243 = shalt.err (!%p3240_p7)
}
  0x12   :  { %s3318_s30 = smov 384   ;;  %s3319_s6 = smov 24  }
  0x13   :  { %39 = dma.hbm_to_vmem [thread:$0]  %s3502_s3, 36864, %s34_s19, [#allocation8], %s3318_s30, %s3318_s30, %s3319_s6  }
  0x14   :  { %s3244_s11 = scalar_lea.hbm %s3500_s1, 768 }
  0x15   :  { %p3245_p8 = scmp.ne.s32.totalorder %s3500_s1, %s3244_s11  ;;  %p3248_p9 = scmp.lt.u32.totalorder %s3244_s11, %s3500_s1 }
  0x17   :  { %p3250_p10 = pnand %p3248_p9, %p3245_p8 }
  0x19   :  { %3253 = shalt.err (!%p3250_p10)
}
  0x1a   :  { %s3254_s16 = scalar_lea.vmem %s3354_s21, 768  ;;  %p3259_p12 = scmp.lt.s32.totalorder %s3354_s21, %s3354_s21 }
  0x1b   :  { %p3255_p11 = scmp.ne.s32.totalorder %s3354_s21, %s3254_s16  ;;  %p3260_p13 = scmp.lt.s32.totalorder %s3254_s16, %s3254_s16 }
  0x1d   :  { %p3261_p0 = por %p3260_p13, %p3259_p12 }
  0x1f   :  { %p3262_p1 = pnand %p3261_p0, %p3255_p11 }
  0x21   :  { %3265 = shalt.err (!%p3262_p1)
}
  0x22   :  { %25 = dma.hbm_to_vmem [thread:$0]  %s3500_s1, 768, %s3354_s21, [#allocation5], %s3318_s30, %s3318_s30, %s3319_s6  }
  0x23   :  { %s3320_s18 = smov [#allocation9]   ;;  %s3266_s23 = scalar_lea.hbm %s3503_s4, 96 }
  0x24   :  { %s46_s19 = sshll.u32 %s3320_s18, 4  ;;  %p3267_p2 = scmp.ne.s32.totalorder %s3503_s4, %s3266_s23  ;;  %s47_s19 = int_to_ptr.vmem [resolvable:$true] %s46_s19 }
  0x25   :  { %p3270_p3 = scmp.lt.u32.totalorder %s3266_s23, %s3503_s4 }
  0x27   :  { %p3272_p4 = pnand %p3270_p3, %p3267_p2 }
  0x29   :  { %3275 = shalt.err (!%p3272_p4)
}
  0x2a   :  { %s3276_s28 = scalar_lea.vmem %s47_s19, 96  ;;  %p3281_p6 = scmp.lt.s32.totalorder %s47_s19, %s47_s19 }
  0x2b   :  { %p3277_p5 = scmp.ne.s32.totalorder %s47_s19, %s3276_s28  ;;  %p3282_p7 = scmp.lt.s32.totalorder %s3276_s28, %s3276_s28 }
  0x2d   :  { %p3283_p8 = por %p3282_p7, %p3281_p6 }
  0x2f   :  { %p3284_p9 = pnand %p3283_p8, %p3277_p5 }
  0x31   :  { %3287 = shalt.err (!%p3284_p9)
}
  0x32   :  { %49 = dma.hbm_to_vmem [thread:$0]  %s3503_s4, 96, %s47_s19, [#allocation8]  }
  0x33   :  { %3310 = dma.done.wait [#allocation5], 768  }
  0x34   :  { %3311 = vsyncadd [#allocation5], 4294966528 }
  0x35   :  { %3312 = dma.done.wait [#allocation8], 36960  }
  0x36   :  { %3313 = vsyncadd [#allocation8], 4294930336  ;;  %v3321_v0 = vmov 0   ;;  %v77_v1 = vld [vmem:[%s3501_s2] sm:$0xff]  ;;  %v2790_v2 = vld [vmem:[#allocation7 + $0x4] ss:$24 sps:$4 sm:$0xff]  }
  0x37   :  { %2789 = vset.pattern.permute.xlu0 %v3321_v0  ;;  %v2792_v3 = vld [vmem:[#allocation7 + $0x304] ss:$24 sps:$4 sm:$0xff]   ;;  %v2794_v4 = vld [vmem:[#allocation7] ss:$24 sps:$4 sm:$0xff]   ;;  %2023 = vmatprep.subr.bf16.mxu1 %v2790_v2  ;;  %v2796_v6 = vld [vmem:[#allocation7 + $0x34] ss:$24 sps:$4 sm:$0xff]  }
  0x38   :  { %80 = vperm.xlu0 %2789, %v77_v1   ;;  %v2795_v5 = vld [vmem:[#allocation7 + $0x300] ss:$24 sps:$4 sm:$0xff]   ;;  %2064 = vmatprep.subr.bf16.mxu0 %v2792_v3  ;;  %v2798_v7 = vld [vmem:[#allocation7 + $0x334] ss:$24 sps:$4 sm:$0xff]   ;;  %v2800_v8 = vld [vmem:[#allocation7 + $0x30] ss:$24 sps:$4 sm:$0xff]  }
  0x39   :  { %2024 = vmatpush1.bf16.msra.mxu1 %v2794_v4  ;;  %2065 = vmatpush1.bf16.msra.mxu0 %v2795_v5  ;;  %v2801_v9 = vld [vmem:[#allocation7 + $0x330] ss:$24 sps:$4 sm:$0xff]   ;;  %v2802_v10 = vld [vmem:[#allocation7 + $0x64] ss:$24 sps:$4 sm:$0xff]   ;;  %v2806_v12 = vld [vmem:[#allocation7 + $0x60] ss:$24 sps:$4 sm:$0xff]  }
  0x3a   :  { %2025 = vmatprep.subr.bf16.mxu1 %v2796_v6  ;;  %2066 = vmatprep.subr.bf16.mxu0 %v2798_v7  ;;  %v2804_v11 = vld [vmem:[#allocation7 + $0x364] ss:$24 sps:$4 sm:$0xff]   ;;  %v2807_v13 = vld [vmem:[#allocation7 + $0x360] ss:$24 sps:$4 sm:$0xff]   ;;  %v2808_v14 = vld [vmem:[#allocation7 + $0x94] ss:$24 sps:$4 sm:$0xff]  }
  0x3b   :  { %v2810_v15 = vld [vmem:[#allocation7 + $0x394] ss:$24 sps:$4 sm:$0xff]   ;;  %v2812_v16 = vld [vmem:[#allocation7 + $0x90] ss:$24 sps:$4 sm:$0xff]   ;;  %v2814_v18 = vld [vmem:[#allocation7 + $0xc4] ss:$24 sps:$4 sm:$0xff]  }
  0x3c   :  { %v2813_v17 = vld [vmem:[#allocation7 + $0x390] ss:$24 sps:$4 sm:$0xff]   ;;  %v2816_v19 = vld [vmem:[#allocation7 + $0x3c4] ss:$24 sps:$4 sm:$0xff]   ;;  %v2818_v20 = vld [vmem:[#allocation7 + $0xc0] ss:$24 sps:$4 sm:$0xff]  }
  0x3d   :  { %2026 = vmatpush1.bf16.msra.mxu1 %v2800_v8  ;;  %2067 = vmatpush1.bf16.msra.mxu0 %v2801_v9  ;;  %v2819_v21 = vld [vmem:[#allocation7 + $0x3c0] ss:$24 sps:$4 sm:$0xff]   ;;  %v2820_v22 = vld [vmem:[#allocation7 + $0xf4] ss:$24 sps:$4 sm:$0xff]   ;;  %v2824_v24 = vld [vmem:[#allocation7 + $0xf0] ss:$24 sps:$4 sm:$0xff]  }
  0x3e   :  { %2027 = vmatprep.subr.bf16.mxu1 %v2802_v10  ;;  %2068 = vmatprep.subr.bf16.mxu0 %v2804_v11  ;;  %v2822_v23 = vld [vmem:[#allocation7 + $0x3f4] ss:$24 sps:$4 sm:$0xff]   ;;  %v2825_v25 = vld [vmem:[#allocation7 + $0x3f0] ss:$24 sps:$4 sm:$0xff]   ;;  %v2826_v26 = vld [vmem:[#allocation7 + $0x124] ss:$24 sps:$4 sm:$0xff]  }
  0x3f   :  { %v2828_v27 = vld [vmem:[#allocation7 + $0x424] ss:$24 sps:$4 sm:$0xff]   ;;  %v2830_v28 = vld [vmem:[#allocation7 + $0x120] ss:$24 sps:$4 sm:$0xff]   ;;  %v2832_v30 = vld [vmem:[#allocation7 + $0x154] ss:$24 sps:$4 sm:$0xff]  }
  0x40   :  { %v2831_v29 = vld [vmem:[#allocation7 + $0x420] ss:$24 sps:$4 sm:$0xff]   ;;  %v2834_v31 = vld [vmem:[#allocation7 + $0x454] ss:$24 sps:$4 sm:$0xff]   ;;  %v2836_v32 = vld [vmem:[#allocation7 + $0x150] ss:$24 sps:$4 sm:$0xff]  }
  0x41   :  { %2028 = vmatpush1.bf16.msra.mxu1 %v2806_v12  ;;  %2069 = vmatpush1.bf16.msra.mxu0 %v2807_v13  ;;  %v2837_v33 = vld [vmem:[#allocation7 + $0x450] ss:$24 sps:$4 sm:$0xff]   ;;  %v2838_v34 = vld [vmem:[#allocation7 + $0x184] ss:$24 sps:$4 sm:$0xff]   ;;  %v2842_v36 = vld [vmem:[#allocation7 + $0x180] ss:$24 sps:$4 sm:$0xff]  }
  0x42   :  { %2029 = vmatprep.subr.bf16.mxu1 %v2808_v14  ;;  %2070 = vmatprep.subr.bf16.mxu0 %v2810_v15  ;;  %v2840_v35 = vld [vmem:[#allocation7 + $0x484] ss:$24 sps:$4 sm:$0xff]   ;;  %v2843_v37 = vld [vmem:[#allocation7 + $0x480] ss:$24 sps:$4 sm:$0xff]   ;;  %v2844_v38 = vld [vmem:[#allocation7 + $0x1b4] ss:$24 sps:$4 sm:$0xff]  }
  0x43   :  { %v2846_v39 = vld [vmem:[#allocation7 + $0x4b4] ss:$24 sps:$4 sm:$0xff]   ;;  %v2848_v40 = vld [vmem:[#allocation7 + $0x1b0] ss:$24 sps:$4 sm:$0xff]   ;;  %v2850_v42 = vld [vmem:[#allocation7 + $0x1e4] ss:$24 sps:$4 sm:$0xff]  }
  0x44   :  { %v2849_v41 = vld [vmem:[#allocation7 + $0x4b0] ss:$24 sps:$4 sm:$0xff]   ;;  %v2852_v43 = vld [vmem:[#allocation7 + $0x4e4] ss:$24 sps:$4 sm:$0xff]   ;;  %v2854_v44 = vld [vmem:[#allocation7 + $0x1e0] ss:$24 sps:$4 sm:$0xff]  }
  0x45   :  { %2030 = vmatpush1.bf16.msra.mxu1 %v2812_v16  ;;  %2071 = vmatpush1.bf16.msra.mxu0 %v2813_v17  ;;  %v2855_v45 = vld [vmem:[#allocation7 + $0x4e0] ss:$24 sps:$4 sm:$0xff]   ;;  %v2856_v46 = vld [vmem:[#allocation7 + $0x214] ss:$24 sps:$4 sm:$0xff]   ;;  %v2860_v48 = vld [vmem:[#allocation7 + $0x210] ss:$24 sps:$4 sm:$0xff]  }
  0x46   :  { %2031 = vmatprep.subr.bf16.mxu1 %v2814_v18  ;;  %2072 = vmatprep.subr.bf16.mxu0 %v2816_v19  ;;  %v2858_v47 = vld [vmem:[#allocation7 + $0x514] ss:$24 sps:$4 sm:$0xff]   ;;  %v2861_v49 = vld [vmem:[#allocation7 + $0x510] ss:$24 sps:$4 sm:$0xff]   ;;  %v2862_v50 = vld [vmem:[#allocation7 + $0x244] ss:$24 sps:$4 sm:$0xff]   ;;  %v3407_v18 = vstv %s3499_s0 }
  0x47   :  { %v2864_v51 = vld [vmem:[#allocation7 + $0x544] ss:$24 sps:$4 sm:$0xff]   ;;  %v2866_v52 = vld [vmem:[#allocation7 + $0x240] ss:$24 sps:$4 sm:$0xff]   ;;  %v2868_v54 = vld [vmem:[#allocation7 + $0x274] ss:$24 sps:$4 sm:$0xff]  }
  0x48   :  { %v2867_v53 = vld [vmem:[#allocation7 + $0x540] ss:$24 sps:$4 sm:$0xff]   ;;  %v2870_v55 = vld [vmem:[#allocation7 + $0x574] ss:$24 sps:$4 sm:$0xff]   ;;  %v2872_v56 = vld [vmem:[#allocation7 + $0x270] ss:$24 sps:$4 sm:$0xff]  }
  0x49   :  { %2032 = vmatpush1.bf16.msra.mxu1 %v2818_v20  ;;  %2073 = vmatpush1.bf16.msra.mxu0 %v2819_v21  ;;  %v2873_v57 = vld [vmem:[#allocation7 + $0x570] ss:$24 sps:$4 sm:$0xff]   ;;  %v2874_v58 = vld [vmem:[#allocation7 + $0x2a4] ss:$24 sps:$4 sm:$0xff]   ;;  %v2878_v60 = vld [vmem:[#allocation7 + $0x2a0] ss:$24 sps:$4 sm:$0xff]  }
  0x4a   :  { %2033 = vmatprep.subr.bf16.mxu1 %v2820_v22  ;;  %2074 = vmatprep.subr.bf16.mxu0 %v2822_v23  ;;  %v2876_v59 = vld [vmem:[#allocation7 + $0x5a4] ss:$24 sps:$4 sm:$0xff]   ;;  %v2879_v61 = vld [vmem:[#allocation7 + $0x5a0] ss:$24 sps:$4 sm:$0xff]   ;;  %v2880_v62 = vld [vmem:[#allocation7 + $0x2d4] ss:$24 sps:$4 sm:$0xff]  }
  0x4b   :  { %v2882_v63 = vld [vmem:[#allocation7 + $0x5d4] ss:$24 sps:$4 sm:$0xff]   ;;  %v2884_v0 = vld [vmem:[#allocation7 + $0x2d0] ss:$24 sps:$4 sm:$0xff]   ;;  %v2888_v3 = vld [vmem:[#allocation7 + $0x604] ss:$24 sps:$4 sm:$0xff]  }
  0x4c   :  { %v2885_v1 = vld [vmem:[#allocation7 + $0x5d0] ss:$24 sps:$4 sm:$0xff]   ;;  %v2891_v2 = vld [vmem:[#allocation7 + $0xc] ss:$24 sps:$4 sm:$0xff]   ;;  %v60_v6 = vld [vmem:[#allocation4 + $0x8] sm:$0xff]  ;;  %vm564_vm0 = vcmask 1041409  }
  0x4d   :  { %2034 = vmatpush1.bf16.msra.mxu1 %v2824_v24  ;;  %2075 = vmatpush1.bf16.msra.mxu0 %v2825_v25  ;;  %v59_v4 = vld [vmem:[#allocation4] sm:$0xff]  ;;  %v62_v5 = vld [vmem:[#allocation4 + $0x18] sm:$0xff]  ;;  %v3400_v8 = vld [vmem:[#allocation4 + $0x10] sm:$0xff]  ;;  %v68_v12 = vunpack.c.h.bf16 %v60_v6  ;;  %v67_v16 = vunpack.c.l.bf16 %v60_v6  ;;  %s3323_s0 = smov [#allocation10]  }
  0x4e   :  { %2035 = vmatprep.subr.bf16.mxu1 %v2826_v26  ;;  %2076 = vmatprep.subr.bf16.mxu0 %v2828_v27  ;;  %v63_v7 = vld [vmem:[#allocation4 + $0x20] sm:$0xff]  ;;  %v3402_v9 = vld [vmem:[#allocation4 + $0x28] sm:$0xff]  ;;  %v66_v10 = vunpack.c.h.bf16 %v59_v4  ;;  %v72_v11 = vunpack.c.h.bf16 %v62_v5  ;;  %v65_v14 = vunpack.c.l.bf16 %v59_v4  ;;  %v71_v15 = vunpack.c.l.bf16 %v62_v5  ;;  %s2452_s6 = sshll.u32 %s3323_s0, 4  ;;  %s2453_s6 = int_to_ptr.vmem [resolvable:$true] %s2452_s6 }
  0x4f   :  { %v74_v13 = vunpack.c.h.bf16 %v63_v7  ;;  %v73_v17 = vunpack.c.l.bf16 %v63_v7  ;;  %v69_v20 = vunpack.c.l.bf16 %v3400_v8  ;;  %v70_v21 = vunpack.c.h.bf16 %v3400_v8  ;;  %s3288_s7 = scalar_lea.vmem %s2453_s6, 96  ;;  %p3293_p11 = scmp.lt.s32.totalorder %s2453_s6, %s2453_s6 }
  0x50   :  { %v75_v22 = vunpack.c.l.bf16 %v3402_v9  ;;  %v76_v23 = vunpack.c.h.bf16 %v3402_v9  ;;  %v2898_v9 = vld [vmem:[#allocation7 + $0x660] ss:$24 sps:$4 sm:$0xff]   ;;  %p3289_p10 = scmp.ne.s32.totalorder %s2453_s6, %s3288_s7  ;;  %p3294_p12 = scmp.lt.s32.totalorder %s3288_s7, %s3288_s7 }
  0x51   :  { %2036 = vmatpush1.bf16.msra.mxu1 %v2830_v28  ;;  %2077 = vmatpush1.bf16.msra.mxu0 %v2831_v29 }
  0x52   :  { %2037 = vmatprep.subr.bf16.mxu1 %v2832_v30  ;;  %2078 = vmatprep.subr.bf16.mxu0 %v2834_v31  ;;  %p3295_p13 = por %p3294_p12, %p3293_p11 }
  0x54   :  { %p3296_p0 = pnand %p3295_p13, %p3289_p10 }
  0x55   :  { %2038 = vmatpush1.bf16.msra.mxu1 %v2836_v32  ;;  %2079 = vmatpush1.bf16.msra.mxu0 %v2837_v33 }
  0x56   :  { %2039 = vmatprep.subr.bf16.mxu1 %v2838_v34  ;;  %2080 = vmatprep.subr.bf16.mxu0 %v2840_v35 }
  0x59   :  { %2040 = vmatpush1.bf16.msra.mxu1 %v2842_v36  ;;  %2081 = vmatpush1.bf16.msra.mxu0 %v2843_v37 }
  0x5a   :  { %2041 = vmatprep.subr.bf16.mxu1 %v2844_v38  ;;  %2082 = vmatprep.subr.bf16.mxu0 %v2846_v39 }
  0x5d   :  { %2042 = vmatpush1.bf16.msra.mxu1 %v2848_v40  ;;  %2083 = vmatpush1.bf16.msra.mxu0 %v2849_v41 }
  0x5e   :  { %2043 = vmatprep.subr.bf16.mxu1 %v2850_v42  ;;  %2084 = vmatprep.subr.bf16.mxu0 %v2852_v43 }
  0x61   :  { %2044 = vmatpush1.bf16.msra.mxu1 %v2854_v44  ;;  %2085 = vmatpush1.bf16.msra.mxu0 %v2855_v45 }
  0x62   :  { %2045 = vmatprep.subr.bf16.mxu1 %v2856_v46  ;;  %2086 = vmatprep.subr.bf16.mxu0 %v2858_v47 }
  0x65   :  { %2046 = vmatpush1.bf16.msra.mxu1 %v2860_v48  ;;  %2087 = vmatpush1.bf16.msra.mxu0 %v2861_v49 }
  0x66   :  { %2047 = vmatprep.subr.bf16.mxu1 %v2862_v50  ;;  %2088 = vmatprep.subr.bf16.mxu0 %v2864_v51 }
  0x69   :  { %2048 = vmatpush1.bf16.msra.mxu1 %v2866_v52  ;;  %2089 = vmatpush1.bf16.msra.mxu0 %v2867_v53 }
  0x6a   :  { %2049 = vmatprep.subr.bf16.mxu1 %v2868_v54  ;;  %2090 = vmatprep.subr.bf16.mxu0 %v2870_v55 }
  0x6d   :  { %2050 = vmatpush1.bf16.msra.mxu1 %v2872_v56  ;;  %2091 = vmatpush1.bf16.msra.mxu0 %v2873_v57 }
  0x6e   :  { %2051 = vmatprep.subr.bf16.mxu1 %v2874_v58  ;;  %2092 = vmatprep.subr.bf16.mxu0 %v2876_v59 }
  0x71   :  { %2052 = vmatpush1.bf16.msra.mxu1 %v2878_v60  ;;  %2093 = vmatpush1.bf16.msra.mxu0 %v2879_v61 }
  0x72   :  { %2053 = vmatprep.subr.bf16.mxu1 %v2880_v62  ;;  %2094 = vmatprep.subr.bf16.mxu0 %v2882_v63 }
  0x75   :  { %2054 = vmatpush1.bf16.msra.mxu1 %v2884_v0  ;;  %2095 = vmatpush1.bf16.msra.mxu0 %v2885_v1 }
  0x76   :  { %2146 = vmatprep.subr.bf16.mxu1 %v2891_v2  ;;  %2105 = vmatprep.subr.bf16.mxu0 %v2888_v3 }
  0xb7   :  { %v3409_v19 = vpop.permute.xlu0 %80 }
  0xb8   :  { %v84_v24 = vmul.f32 %v3409_v19, %v66_v10  ;;  %v90_v25 = vmul.f32 %v3409_v19, %v72_v11  ;;  %v86_v26 = vmul.f32 %v3409_v19, %v68_v12  ;;  %v92_v27 = vmul.f32 %v3409_v19, %v74_v13 }
  0xb9   :  { %v83_v28 = vmul.f32 %v3409_v19, %v65_v14  ;;  %v89_v29 = vmul.f32 %v3409_v19, %v71_v15  ;;  %v85_v30 = vmul.f32 %v3409_v19, %v67_v16  ;;  %v91_v31 = vmul.f32 %v3409_v19, %v73_v17 }
  0xba   :  { %v101_v32 = vrot.slane %v84_v24, 4  ;;  %v137_v33 = vrot.slane %v90_v25, 4  ;;  %v113_v34 = vrot.slane %v86_v26, 4  ;;  %v149_v35 = vrot.slane %v92_v27, 4 }
  0xbb   :  { %v95_v36 = vrot.slane %v83_v28, 4  ;;  %v131_v37 = vrot.slane %v89_v29, 4  ;;  %v107_v38 = vrot.slane %v85_v30, 4  ;;  %v143_v39 = vrot.slane %v91_v31, 4 }
  0xbc   :  { %v102_v40 = vadd.f32 %v101_v32, %v84_v24  ;;  %v138_v41 = vadd.f32 %v137_v33, %v90_v25  ;;  %v114_v42 = vadd.f32 %v113_v34, %v86_v26  ;;  %v150_v43 = vadd.f32 %v149_v35, %v92_v27 }
  0xbd   :  { %v96_v44 = vadd.f32 %v95_v36, %v83_v28  ;;  %v132_v45 = vadd.f32 %v131_v37, %v89_v29  ;;  %v108_v46 = vadd.f32 %v107_v38, %v85_v30  ;;  %v144_v47 = vadd.f32 %v143_v39, %v91_v31 }
  0xbe   :  { %v103_v48 = vrot.slane %v102_v40, 2  ;;  %v139_v49 = vrot.slane %v138_v41, 2  ;;  %v115_v50 = vrot.slane %v114_v42, 2  ;;  %v151_v51 = vrot.slane %v150_v43, 2 }
  0xbf   :  { %v97_v52 = vrot.slane %v96_v44, 2  ;;  %v133_v53 = vrot.slane %v132_v45, 2  ;;  %v109_v54 = vrot.slane %v108_v46, 2  ;;  %v145_v55 = vrot.slane %v144_v47, 2 }
  0xc0   :  { %v104_v56 = vadd.f32 %v103_v48, %v102_v40  ;;  %v140_v57 = vadd.f32 %v139_v49, %v138_v41  ;;  %v116_v58 = vadd.f32 %v115_v50, %v114_v42  ;;  %v152_v59 = vadd.f32 %v151_v51, %v150_v43 }
  0xc1   :  { %v98_v60 = vadd.f32 %v97_v52, %v96_v44  ;;  %v134_v61 = vadd.f32 %v133_v53, %v132_v45  ;;  %v110_v62 = vadd.f32 %v109_v54, %v108_v46  ;;  %v146_v63 = vadd.f32 %v145_v55, %v144_v47  ;;  %v2886_v44 = vld [vmem:[#allocation7 + $0x600] ss:$24 sps:$4 sm:$0xff]   ;;  %v2894_v54 = vld [vmem:[#allocation7 + $0x634] ss:$24 sps:$4 sm:$0xff]  }
  0xc2   :  { %v105_v0 = vrot.slane %v104_v56, 1  ;;  %v141_v1 = vrot.slane %v140_v57, 1  ;;  %v117_v2 = vrot.slane %v116_v58, 1  ;;  %v153_v3 = vrot.slane %v152_v59, 1  ;;  %v2889_v45 = vld [vmem:[#allocation7 + $0x8] ss:$24 sps:$4 sm:$0xff]  }
  0xc3   :  { %v99_v4 = vrot.slane %v98_v60, 1  ;;  %v135_v5 = vrot.slane %v134_v61, 1  ;;  %v111_v6 = vrot.slane %v110_v62, 1  ;;  %v147_v7 = vrot.slane %v146_v63, 1 }
  0xc4   :  { %v106_v10 = vadd.f32 %v105_v0, %v104_v56  ;;  %v142_v11 = vadd.f32 %v141_v1, %v140_v57  ;;  %v118_v12 = vadd.f32 %v117_v2, %v116_v58  ;;  %v154_v13 = vadd.f32 %v153_v3, %v152_v59  ;;  %v2897_v59 = vld [vmem:[#allocation7 + $0x3c] ss:$24 sps:$4 sm:$0xff]   ;;  %v2892_v2 = vld [vmem:[#allocation7 + $0x630] ss:$24 sps:$4 sm:$0xff]  }
  0xc5   :  { %v100_v14 = vadd.f32 %v99_v4, %v98_v60  ;;  %v136_v15 = vadd.f32 %v135_v5, %v134_v61  ;;  %v112_v16 = vadd.f32 %v111_v6, %v110_v62  ;;  %v148_v17 = vadd.f32 %v147_v7, %v146_v63  ;;  %v2895_v3 = vld [vmem:[#allocation7 + $0x38] ss:$24 sps:$4 sm:$0xff]   ;;  %v2900_v4 = vld [vmem:[#allocation7 + $0x664] ss:$24 sps:$4 sm:$0xff]  }
  0xc6   :  { %v170_v24 = vadd.f32 %v3407_v18, %v106_v10  ;;  %v176_v25 = vadd.f32 %v3407_v18, %v142_v11  ;;  %v172_v26 = vadd.f32 %v3407_v18, %v118_v12  ;;  %v178_v27 = vadd.f32 %v3407_v18, %v154_v13  ;;  %v2903_v5 = vld [vmem:[#allocation7 + $0x6c] ss:$24 sps:$4 sm:$0xff]   ;;  %v2901_v12 = vld [vmem:[#allocation7 + $0x68] ss:$24 sps:$4 sm:$0xff]  }
  0xc7   :  { %v169_v28 = vadd.f32 %v3407_v18, %v100_v14  ;;  %v175_v29 = vadd.f32 %v3407_v18, %v136_v15  ;;  %v171_v30 = vadd.f32 %v3407_v18, %v112_v16  ;;  %v177_v31 = vadd.f32 %v3407_v18, %v148_v17  ;;  %v2906_v17 = vld [vmem:[#allocation7 + $0x694] ss:$24 sps:$4 sm:$0xff]  }
  0xc8   :  { %v182_v32 = vpack.c.bf16 %v170_v24, %v170_v24  ;;  %v188_v33 = vpack.c.bf16 %v176_v25, %v176_v25  ;;  %v184_v34 = vpack.c.bf16 %v172_v26, %v172_v26  ;;  %v190_v35 = vpack.c.bf16 %v178_v27, %v178_v27  ;;  %v2909_v24 = vld [vmem:[#allocation7 + $0x9c] ss:$24 sps:$4 sm:$0xff]   ;;  %v2904_v25 = vld [vmem:[#allocation7 + $0x690] ss:$24 sps:$4 sm:$0xff]  }
  0xc9   :  { %v181_v36 = vpack.c.bf16 %v169_v28, %v169_v28  ;;  %v187_v37 = vpack.c.bf16 %v175_v29, %v175_v29  ;;  %v183_v38 = vpack.c.bf16 %v171_v30, %v171_v30  ;;  %v189_v39 = vpack.c.bf16 %v177_v31, %v177_v31  ;;  %v2907_v26 = vld [vmem:[#allocation7 + $0x98] ss:$24 sps:$4 sm:$0xff]  }
  0xca   :  { %v553_v40 = vunpack.c.l.b16 %v182_v32  ;;  %v559_v41 = vunpack.c.l.b16 %v188_v33  ;;  %v555_v42 = vunpack.c.l.b16 %v184_v34  ;;  %v561_v43 = vunpack.c.l.b16 %v190_v35  ;;  %v2912_v35 = vld [vmem:[#allocation7 + $0x6c4] ss:$24 sps:$4 sm:$0xff]  }
  0xcb   :  { %v552_v46 = vunpack.c.l.b16 %v181_v36  ;;  %v558_v47 = vunpack.c.l.b16 %v187_v37  ;;  %v554_v48 = vunpack.c.l.b16 %v183_v38  ;;  %v560_v49 = vunpack.c.l.b16 %v189_v39  ;;  %v2915_v36 = vld [vmem:[#allocation7 + $0xcc] ss:$24 sps:$4 sm:$0xff]   ;;  %v2910_v37 = vld [vmem:[#allocation7 + $0x6c0] ss:$24 sps:$4 sm:$0xff]  }
  0xcc   :  { %v566_v50 = vsel %vm564_vm0, %v559_v41, %v553_v40  ;;  %v568_v51 = vsel %vm564_vm0, %v561_v43, %v555_v42  ;;  %v88_v52 = vmul.f32 %v3409_v19, %v70_v21  ;;  %v94_v53 = vmul.f32 %v3409_v19, %v76_v23  ;;  %v2913_v38 = vld [vmem:[#allocation7 + $0xc8] ss:$24 sps:$4 sm:$0xff]  }
  0xcd   :  { %v3439_v55 = vpack.c.b16 %v566_v50, %v566_v50  ;;  %v3441_v56 = vpack.c.b16 %v568_v51, %v568_v51  ;;  %v565_v57 = vsel %vm564_vm0, %v558_v47, %v552_v46  ;;  %v567_v58 = vsel %vm564_vm0, %v560_v49, %v554_v48  ;;  %v2918_v47 = vld [vmem:[#allocation7 + $0x6f4] ss:$24 sps:$4 sm:$0xff]   ;;  %v2916_v49 = vld [vmem:[#allocation7 + $0x6f0] ss:$24 sps:$4 sm:$0xff]  }
  0xce   :  { %v3445_v60 = vpack.c.b16 %v565_v57, %v565_v57  ;;  %v3447_v61 = vpack.c.b16 %v567_v58, %v567_v58  ;;  %v125_v62 = vrot.slane %v88_v52, 4  ;;  %v161_v21 = vrot.slane %v94_v53, 4  ;;  %v2921_v48 = vld [vmem:[#allocation7 + $0xfc] ss:$24 sps:$4 sm:$0xff]   ;;  %v2919_v50 = vld [vmem:[#allocation7 + $0xf8] ss:$24 sps:$4 sm:$0xff]  }
  0xcf   :  { %2055 = vmatprep.mubr.bf16.mxu1 %v3439_v55  ;;  %2096 = vmatprep.mubr.bf16.mxu0 %v3441_v56  ;;  %v87_v23 = vmul.f32 %v3409_v19, %v69_v20  ;;  %v93_v63 = vmul.f32 %v3409_v19, %v75_v22 }
  0xd0   :  { %2056 = vmatmul.mubr.bf16.vlgmr.msra.gmra.mrb[0].mxu1 %v3445_v60  ;;  %2097 = vmatmul.mubr.bf16.vlgmr.msra.gmra.mrb[0].mxu0 %v3447_v61  ;;  %v126_v0 = vadd.f32 %v125_v62, %v88_v52  ;;  %v162_v1 = vadd.f32 %v161_v21, %v94_v53  ;;  %v2922_v62 = vld [vmem:[#allocation7 + $0x720] ss:$24 sps:$4 sm:$0xff]  }
  0xd1   :  { %2106 = vmatpush1.bf16.msra.mxu0 %v2886_v44  ;;  %2147 = vmatpush1.bf16.msra.mxu1 %v2889_v45  ;;  %v119_v6 = vrot.slane %v87_v23, 4  ;;  %v155_v8 = vrot.slane %v93_v63, 4  ;;  %v2925_v21 = vld [vmem:[#allocation7 + $0x128] ss:$24 sps:$4 sm:$0xff]  }
  0xd2   :  { %v127_v7 = vrot.slane %v126_v0, 2  ;;  %v163_v20 = vrot.slane %v162_v1, 2  ;;  %2178 = vmatprep.mubr.bf16.mxu1 %v3439_v55  ;;  %2107 = vmatprep.subr.bf16.mxu0 %v2894_v54 }
  0xd3   :  { %2148 = vmatprep.subr.bf16.mxu1 %v2897_v59  ;;  %v120_v19 = vadd.f32 %v119_v6, %v87_v23  ;;  %v156_v22 = vadd.f32 %v155_v8, %v93_v63  ;;  %v2927_v59 = vld [vmem:[#allocation7 + $0x12c] ss:$24 sps:$4 sm:$0xff]   ;;  %v2937_v6 = vld [vmem:[#allocation7 + $0x188] ss:$24 sps:$4 sm:$0xff]  }
  0xd4   :  { %v128_v10 = vadd.f32 %v127_v7, %v126_v0  ;;  %v164_v11 = vadd.f32 %v163_v20, %v162_v1  ;;  %v2930_v63 = vld [vmem:[#allocation7 + $0x754] ss:$24 sps:$4 sm:$0xff]   ;;  %v2928_v1 = vld [vmem:[#allocation7 + $0x750] ss:$24 sps:$4 sm:$0xff]  }
  0xd5   :  { %2108 = vmatpush1.bf16.msra.mxu0 %v2892_v2  ;;  %2149 = vmatpush1.bf16.msra.mxu1 %v2895_v3  ;;  %v121_v13 = vrot.slane %v120_v19, 2  ;;  %v157_v14 = vrot.slane %v156_v22, 2  ;;  %v2933_v0 = vld [vmem:[#allocation7 + $0x15c] ss:$24 sps:$4 sm:$0xff]   ;;  %v2931_v2 = vld [vmem:[#allocation7 + $0x158] ss:$24 sps:$4 sm:$0xff]  }
  0xd6   :  { %v129_v15 = vrot.slane %v128_v10, 1  ;;  %v165_v16 = vrot.slane %v164_v11, 1  ;;  %2109 = vmatprep.subr.bf16.mxu0 %v2900_v4  ;;  %2150 = vmatprep.subr.bf16.mxu1 %v2903_v5  ;;  %v2936_v3 = vld [vmem:[#allocation7 + $0x784] ss:$24 sps:$4 sm:$0xff]   ;;  %v2934_v5 = vld [vmem:[#allocation7 + $0x780] ss:$24 sps:$4 sm:$0xff]  }
  0xd7   :  { %v122_v27 = vadd.f32 %v121_v13, %v120_v19  ;;  %v158_v28 = vadd.f32 %v157_v14, %v156_v22  ;;  %v2939_v4 = vld [vmem:[#allocation7 + $0x18c] ss:$24 sps:$4 sm:$0xff]   ;;  %v2945_v7 = vld [vmem:[#allocation7 + $0x1bc] ss:$24 sps:$4 sm:$0xff]   ;;  %v2940_v20 = vld [vmem:[#allocation7 + $0x7b0] ss:$24 sps:$4 sm:$0xff]  }
  0xd8   :  { %v130_v29 = vadd.f32 %v129_v15, %v128_v10  ;;  %v166_v30 = vadd.f32 %v165_v16, %v164_v11  ;;  %v2942_v8 = vld [vmem:[#allocation7 + $0x7b4] ss:$24 sps:$4 sm:$0xff]   ;;  %v2948_v19 = vld [vmem:[#allocation7 + $0x7e4] ss:$24 sps:$4 sm:$0xff]   ;;  %v2946_v10 = vld [vmem:[#allocation7 + $0x7e0] ss:$24 sps:$4 sm:$0xff]  }
  0xd9   :  { %2110 = vmatpush1.bf16.msra.mxu0 %v2898_v9  ;;  %2151 = vmatpush1.bf16.msra.mxu1 %v2901_v12  ;;  %v123_v31 = vrot.slane %v122_v27, 1  ;;  %v159_v32 = vrot.slane %v158_v28, 1  ;;  %v2943_v9 = vld [vmem:[#allocation7 + $0x1b8] ss:$24 sps:$4 sm:$0xff]   ;;  %v2951_v22 = vld [vmem:[#allocation7 + $0x1ec] ss:$24 sps:$4 sm:$0xff]  }
  0xda   :  { %v174_v33 = vadd.f32 %v3407_v18, %v130_v29  ;;  %v180_v34 = vadd.f32 %v3407_v18, %v166_v30  ;;  %2111 = vmatprep.subr.bf16.mxu0 %v2906_v17  ;;  %2152 = vmatprep.subr.bf16.mxu1 %v2909_v24  ;;  %v2949_v11 = vld [vmem:[#allocation7 + $0x1e8] ss:$24 sps:$4 sm:$0xff]   ;;  %v2954_v12 = vld [vmem:[#allocation7 + $0x814] ss:$24 sps:$4 sm:$0xff]   ;;  %v2955_v15 = vld [vmem:[#allocation7 + $0x218] ss:$24 sps:$4 sm:$0xff]  }
  0xdb   :  { %v124_v39 = vadd.f32 %v123_v31, %v122_v27  ;;  %v160_v40 = vadd.f32 %v159_v32, %v158_v28  ;;  %v2957_v13 = vld [vmem:[#allocation7 + $0x21c] ss:$24 sps:$4 sm:$0xff]   ;;  %v2952_v14 = vld [vmem:[#allocation7 + $0x810] ss:$24 sps:$4 sm:$0xff]   ;;  %v2963_v17 = vld [vmem:[#allocation7 + $0x24c] ss:$24 sps:$4 sm:$0xff]  }
  0xdc   :  { %v186_v41 = vpack.c.bf16 %v174_v33, %v174_v33  ;;  %v192_v42 = vpack.c.bf16 %v180_v34, %v180_v34  ;;  %v2960_v16 = vld [vmem:[#allocation7 + $0x844] ss:$24 sps:$4 sm:$0xff]   ;;  %v2958_v24 = vld [vmem:[#allocation7 + $0x840] ss:$24 sps:$4 sm:$0xff]   ;;  %v2964_v28 = vld [vmem:[#allocation7 + $0x870] ss:$24 sps:$4 sm:$0xff]  }
  0xdd   :  { %2112 = vmatpush1.bf16.msra.mxu0 %v2904_v25  ;;  %2153 = vmatpush1.bf16.msra.mxu1 %v2907_v26  ;;  %v173_v43 = vadd.f32 %v3407_v18, %v124_v39  ;;  %v179_v44 = vadd.f32 %v3407_v18, %v160_v40  ;;  %v2924_v18 = vld [vmem:[#allocation7 + $0x724] ss:$24 sps:$4 sm:$0xff]   ;;  %v2961_v25 = vld [vmem:[#allocation7 + $0x248] ss:$24 sps:$4 sm:$0xff]   ;;  %v2966_v26 = vld [vmem:[#allocation7 + $0x874] ss:$24 sps:$4 sm:$0xff]  }
  0xde   :  { %v557_v45 = vunpack.c.l.b16 %v186_v41  ;;  %v563_v46 = vunpack.c.l.b16 %v192_v42  ;;  %2113 = vmatprep.subr.bf16.mxu0 %v2912_v35  ;;  %2154 = vmatprep.subr.bf16.mxu1 %v2915_v36  ;;  %v2969_v27 = vld [vmem:[#allocation7 + $0x27c] ss:$24 sps:$4 sm:$0xff]   ;;  %v2967_v29 = vld [vmem:[#allocation7 + $0x278] ss:$24 sps:$4 sm:$0xff]   ;;  %v2975_v31 = vld [vmem:[#allocation7 + $0x2ac] ss:$24 sps:$4 sm:$0xff]  }
  0xdf   :  { %v185_v51 = vpack.c.bf16 %v173_v43, %v173_v43  ;;  %v191_v52 = vpack.c.bf16 %v179_v44, %v179_v44  ;;  %v2972_v30 = vld [vmem:[#allocation7 + $0x8a4] ss:$24 sps:$4 sm:$0xff]   ;;  %v2970_v32 = vld [vmem:[#allocation7 + $0x8a0] ss:$24 sps:$4 sm:$0xff]   ;;  %v2978_v34 = vld [vmem:[#allocation7 + $0x8d4] ss:$24 sps:$4 sm:$0xff]  }
  0xe0   :  { %v570_v53 = vsel %vm564_vm0, %v563_v46, %v557_v45  ;;  %v2973_v33 = vld [vmem:[#allocation7 + $0x2a8] ss:$24 sps:$4 sm:$0xff]   ;;  %v2981_v35 = vld [vmem:[#allocation7 + $0x2dc] ss:$24 sps:$4 sm:$0xff]   ;;  %v2988_v45 = vld [vmem:[#allocation7 + $0x338] ss:$24 sps:$4 sm:$0xff]  }
  0xe1   :  { %v3465_v54 = vpack.c.b16 %v570_v53, %v570_v53  ;;  %2114 = vmatpush1.bf16.msra.mxu0 %v2910_v37  ;;  %2155 = vmatpush1.bf16.msra.mxu1 %v2913_v38  ;;  %v556_v57 = vunpack.c.l.b16 %v185_v51  ;;  %v562_v58 = vunpack.c.l.b16 %v191_v52  ;;  %v2976_v36 = vld [vmem:[#allocation7 + $0x8d0] ss:$24 sps:$4 sm:$0xff]   ;;  %v2984_v38 = vld [vmem:[#allocation7 + $0x30c] ss:$24 sps:$4 sm:$0xff]   ;;  %v2990_v43 = vld [vmem:[#allocation7 + $0x33c] ss:$24 sps:$4 sm:$0xff]  }
  0xe2   :  { %2115 = vmatprep.subr.bf16.mxu0 %v2918_v47  ;;  %2156 = vmatprep.subr.bf16.mxu1 %v2921_v48  ;;  %v2979_v37 = vld [vmem:[#allocation7 + $0x2d8] ss:$24 sps:$4 sm:$0xff]   ;;  %v2987_v39 = vld [vmem:[#allocation7 + $0x14] ss:$24 sps:$4 sm:$0xff]   ;;  %v2982_v40 = vld [vmem:[#allocation7 + $0x308] ss:$24 sps:$4 sm:$0xff]  }
  0xe3   :  { %2137 = vmatprep.mubr.bf16.mxu0 %v3465_v54  ;;  %v3469_v23 = vsel %vm564_vm0, %v562_v58, %v556_v57  ;;  %v2985_v42 = vld [vmem:[#allocation7 + $0x10] ss:$24 sps:$4 sm:$0xff]   ;;  %v2993_v44 = vld [vmem:[#allocation7 + $0x44] ss:$24 sps:$4 sm:$0xff]   ;;  %v2991_v46 = vld [vmem:[#allocation7 + $0x40] ss:$24 sps:$4 sm:$0xff]  }
  0xe4   :  { %v3473_v41 = vpack.c.b16 %v3469_v23, %v3469_v23  ;;  %v2996_v47 = vld [vmem:[#allocation7 + $0x36c] ss:$24 sps:$4 sm:$0xff]   ;;  %v3002_v51 = vld [vmem:[#allocation7 + $0x39c] ss:$24 sps:$4 sm:$0xff]   ;;  %v3000_v53 = vld [vmem:[#allocation7 + $0x398] ss:$24 sps:$4 sm:$0xff]  }
  0xe5   :  { %2116 = vmatpush1.bf16.msra.mxu0 %v2916_v49  ;;  %2157 = vmatpush1.bf16.msra.mxu1 %v2919_v50  ;;  %v2999_v48 = vld [vmem:[#allocation7 + $0x74] ss:$24 sps:$4 sm:$0xff]   ;;  %v2994_v49 = vld [vmem:[#allocation7 + $0x368] ss:$24 sps:$4 sm:$0xff]   ;;  %v3005_v52 = vld [vmem:[#allocation7 + $0xa4] ss:$24 sps:$4 sm:$0xff]  }
  0xe6   :  { %2117 = vmatprep.subr.bf16.mxu0 %v2924_v18  ;;  %2158 = vmatprep.subr.bf16.mxu1 %v2927_v59  ;;  %v2997_v50 = vld [vmem:[#allocation7 + $0x70] ss:$24 sps:$4 sm:$0xff]   ;;  %v3003_v57 = vld [vmem:[#allocation7 + $0xa0] ss:$24 sps:$4 sm:$0xff]   ;;  %v3008_v58 = vld [vmem:[#allocation7 + $0x3cc] ss:$24 sps:$4 sm:$0xff]  }
  0xe7   :  { %v3006_v18 = vld [vmem:[#allocation7 + $0x3c8] ss:$24 sps:$4 sm:$0xff]   ;;  %v3012_v23 = vld [vmem:[#allocation7 + $0x3f8] ss:$24 sps:$4 sm:$0xff]  }
  0xe8   :  { %v3009_v59 = vld [vmem:[#allocation7 + $0xd0] ss:$24 sps:$4 sm:$0xff]  }
  0xe9   :  { %2118 = vmatpush1.bf16.msra.mxu0 %v2922_v62  ;;  %2159 = vmatpush1.bf16.msra.mxu1 %v2925_v21  ;;  %v3014_v62 = vld [vmem:[#allocation7 + $0x3fc] ss:$24 sps:$4 sm:$0xff]  }
  0xea   :  { %2119 = vmatprep.subr.bf16.mxu0 %v2930_v63  ;;  %2160 = vmatprep.subr.bf16.mxu1 %v2933_v0  ;;  %v3017_v21 = vld [vmem:[#allocation7 + $0x104] ss:$24 sps:$4 sm:$0xff]   ;;  %v3015_v63 = vld [vmem:[#allocation7 + $0x100] ss:$24 sps:$4 sm:$0xff]  }
  0xeb   :  { %v3020_v0 = vld [vmem:[#allocation7 + $0x42c] ss:$24 sps:$4 sm:$0xff]  }
  0xed   :  { %2120 = vmatpush1.bf16.msra.mxu0 %v2928_v1  ;;  %2161 = vmatpush1.bf16.msra.mxu1 %v2931_v2  ;;  %v3023_v1 = vld [vmem:[#allocation7 + $0x134] ss:$24 sps:$4 sm:$0xff]   ;;  %v3018_v2 = vld [vmem:[#allocation7 + $0x428] ss:$24 sps:$4 sm:$0xff]  }
  0xee   :  { %2121 = vmatprep.subr.bf16.mxu0 %v2936_v3  ;;  %2162 = vmatprep.subr.bf16.mxu1 %v2939_v4  ;;  %v3021_v3 = vld [vmem:[#allocation7 + $0x130] ss:$24 sps:$4 sm:$0xff]   ;;  %v3026_v4 = vld [vmem:[#allocation7 + $0x45c] ss:$24 sps:$4 sm:$0xff]  }
  0xf1   :  { %2122 = vmatpush1.bf16.msra.mxu0 %v2934_v5  ;;  %2163 = vmatpush1.bf16.msra.mxu1 %v2937_v6  ;;  %v3029_v5 = vld [vmem:[#allocation7 + $0x164] ss:$24 sps:$4 sm:$0xff]   ;;  %v3024_v6 = vld [vmem:[#allocation7 + $0x458] ss:$24 sps:$4 sm:$0xff]  }
  0xf2   :  { %2123 = vmatprep.subr.bf16.mxu0 %v2942_v8  ;;  %2164 = vmatprep.subr.bf16.mxu1 %v2945_v7  ;;  %v3027_v8 = vld [vmem:[#allocation7 + $0x160] ss:$24 sps:$4 sm:$0xff]   ;;  %v3032_v7 = vld [vmem:[#allocation7 + $0x48c] ss:$24 sps:$4 sm:$0xff]  }
  0xf5   :  { %2124 = vmatpush1.bf16.msra.mxu0 %v2940_v20  ;;  %2165 = vmatpush1.bf16.msra.mxu1 %v2943_v9  ;;  %v3035_v20 = vld [vmem:[#allocation7 + $0x194] ss:$24 sps:$4 sm:$0xff]   ;;  %v3030_v9 = vld [vmem:[#allocation7 + $0x488] ss:$24 sps:$4 sm:$0xff]  }
  0xf6   :  { %2125 = vmatprep.subr.bf16.mxu0 %v2948_v19  ;;  %2166 = vmatprep.subr.bf16.mxu1 %v2951_v22  ;;  %v3033_v19 = vld [vmem:[#allocation7 + $0x190] ss:$24 sps:$4 sm:$0xff]   ;;  %v3038_v22 = vld [vmem:[#allocation7 + $0x4bc] ss:$24 sps:$4 sm:$0xff]  }
  0xf9   :  { %2126 = vmatpush1.bf16.msra.mxu0 %v2946_v10  ;;  %2167 = vmatpush1.bf16.msra.mxu1 %v2949_v11  ;;  %v3041_v10 = vld [vmem:[#allocation7 + $0x1c4] ss:$24 sps:$4 sm:$0xff]   ;;  %v3036_v11 = vld [vmem:[#allocation7 + $0x4b8] ss:$24 sps:$4 sm:$0xff]  }
  0xfa   :  { %2127 = vmatprep.subr.bf16.mxu0 %v2954_v12  ;;  %2168 = vmatprep.subr.bf16.mxu1 %v2957_v13  ;;  %v3039_v12 = vld [vmem:[#allocation7 + $0x1c0] ss:$24 sps:$4 sm:$0xff]   ;;  %v3044_v13 = vld [vmem:[#allocation7 + $0x4ec] ss:$24 sps:$4 sm:$0xff]  }
  0xfd   :  { %2128 = vmatpush1.bf16.msra.mxu0 %v2952_v14  ;;  %2169 = vmatpush1.bf16.msra.mxu1 %v2955_v15  ;;  %v3047_v14 = vld [vmem:[#allocation7 + $0x1f4] ss:$24 sps:$4 sm:$0xff]   ;;  %v3042_v15 = vld [vmem:[#allocation7 + $0x4e8] ss:$24 sps:$4 sm:$0xff]  }
  0xfe   :  { %2129 = vmatprep.subr.bf16.mxu0 %v2960_v16  ;;  %2170 = vmatprep.subr.bf16.mxu1 %v2963_v17  ;;  %v3045_v16 = vld [vmem:[#allocation7 + $0x1f0] ss:$24 sps:$4 sm:$0xff]   ;;  %v3050_v17 = vld [vmem:[#allocation7 + $0x51c] ss:$24 sps:$4 sm:$0xff]  }
 0x101   :  { %2130 = vmatpush1.bf16.msra.mxu0 %v2958_v24  ;;  %2171 = vmatpush1.bf16.msra.mxu1 %v2961_v25  ;;  %v3053_v24 = vld [vmem:[#allocation7 + $0x224] ss:$24 sps:$4 sm:$0xff]   ;;  %v3048_v25 = vld [vmem:[#allocation7 + $0x518] ss:$24 sps:$4 sm:$0xff]  }
 0x102   :  { %2131 = vmatprep.subr.bf16.mxu0 %v2966_v26  ;;  %2172 = vmatprep.subr.bf16.mxu1 %v2969_v27  ;;  %v3051_v26 = vld [vmem:[#allocation7 + $0x220] ss:$24 sps:$4 sm:$0xff]   ;;  %v3056_v27 = vld [vmem:[#allocation7 + $0x54c] ss:$24 sps:$4 sm:$0xff]  }
 0x105   :  { %2132 = vmatpush1.bf16.msra.mxu0 %v2964_v28  ;;  %2173 = vmatpush1.bf16.msra.mxu1 %v2967_v29  ;;  %v3059_v28 = vld [vmem:[#allocation7 + $0x254] ss:$24 sps:$4 sm:$0xff]   ;;  %v3054_v29 = vld [vmem:[#allocation7 + $0x548] ss:$24 sps:$4 sm:$0xff]  }
 0x106   :  { %2133 = vmatprep.subr.bf16.mxu0 %v2972_v30  ;;  %2174 = vmatprep.subr.bf16.mxu1 %v2975_v31  ;;  %v3057_v30 = vld [vmem:[#allocation7 + $0x250] ss:$24 sps:$4 sm:$0xff]   ;;  %v3062_v31 = vld [vmem:[#allocation7 + $0x57c] ss:$24 sps:$4 sm:$0xff]  }
 0x109   :  { %2134 = vmatpush1.bf16.msra.mxu0 %v2970_v32  ;;  %2175 = vmatpush1.bf16.msra.mxu1 %v2973_v33  ;;  %v3065_v32 = vld [vmem:[#allocation7 + $0x284] ss:$24 sps:$4 sm:$0xff]   ;;  %v3060_v33 = vld [vmem:[#allocation7 + $0x578] ss:$24 sps:$4 sm:$0xff]  }
 0x10a   :  { %2135 = vmatprep.subr.bf16.mxu0 %v2978_v34  ;;  %2176 = vmatprep.subr.bf16.mxu1 %v2981_v35  ;;  %v3063_v34 = vld [vmem:[#allocation7 + $0x280] ss:$24 sps:$4 sm:$0xff]   ;;  %v3068_v35 = vld [vmem:[#allocation7 + $0x5ac] ss:$24 sps:$4 sm:$0xff]  }
 0x10d   :  { %2136 = vmatpush1.bf16.msra.mxu0 %v2976_v36  ;;  %2177 = vmatpush1.bf16.msra.mxu1 %v2979_v37  ;;  %v3071_v36 = vld [vmem:[#allocation7 + $0x2b4] ss:$24 sps:$4 sm:$0xff]   ;;  %v3066_v37 = vld [vmem:[#allocation7 + $0x5a8] ss:$24 sps:$4 sm:$0xff]  }
 0x10e   :  { %2187 = vmatprep.subr.bf16.mxu1 %v2984_v38  ;;  %2269 = vmatprep.subr.bf16.mxu0 %v2987_v39  ;;  %v3069_v38 = vld [vmem:[#allocation7 + $0x2b0] ss:$24 sps:$4 sm:$0xff]   ;;  %v3074_v39 = vld [vmem:[#allocation7 + $0x5dc] ss:$24 sps:$4 sm:$0xff]  }
 0x110   :  { %2138 = vmatmul.mubr.bf16.vlgmr.msra.gmra.mrb[0].mxu0 %v3473_v41  ;;  %2179 = vmatmul.mubr.bf16.vlgmr.msra.gmra.mrb[4].mxu1 %v3445_v60 }
 0x111   :  { %2188 = vmatpush1.bf16.msra.mxu1 %v2982_v40  ;;  %2219 = vmatprep.mubr.bf16.mxu1 %v3441_v56  ;;  %v3077_v40 = vld [vmem:[#allocation7 + $0x2e4] ss:$24 sps:$4 sm:$0xff]  }
 0x112   :  { %2270 = vmatpush1.bf16.msra.mxu0 %v2985_v42  ;;  %2301 = vmatprep.mubr.bf16.mxu0 %v3439_v55  ;;  %v3011_v55 = vld [vmem:[#allocation7 + $0xd4] ss:$24 sps:$4 sm:$0xff]   ;;  %v3072_v42 = vld [vmem:[#allocation7 + $0x5d8] ss:$24 sps:$4 sm:$0xff]  }
 0x113   :  { %2189 = vmatprep.subr.bf16.mxu1 %v2990_v43  ;;  %2271 = vmatprep.subr.bf16.mxu0 %v2993_v44  ;;  %v3075_v43 = vld [vmem:[#allocation7 + $0x2e0] ss:$24 sps:$4 sm:$0xff]   ;;  %v3080_v44 = vld [vmem:[#allocation7 + $0x60c] ss:$24 sps:$4 sm:$0xff]  }
 0x115   :  { %2190 = vmatpush1.bf16.msra.mxu1 %v2988_v45  ;;  %v3083_v45 = vld [vmem:[#allocation7 + $0x314] ss:$24 sps:$4 sm:$0xff]  }
 0x116   :  { %2272 = vmatpush1.bf16.msra.mxu0 %v2991_v46  ;;  %2191 = vmatprep.subr.bf16.mxu1 %v2996_v47  ;;  %v3078_v46 = vld [vmem:[#allocation7 + $0x608] ss:$24 sps:$4 sm:$0xff]  }
 0x117   :  { %2273 = vmatprep.subr.bf16.mxu0 %v2999_v48  ;;  %v3081_v47 = vld [vmem:[#allocation7 + $0x310] ss:$24 sps:$4 sm:$0xff]   ;;  %v3086_v48 = vld [vmem:[#allocation7 + $0x63c] ss:$24 sps:$4 sm:$0xff]  }
 0x119   :  { %2192 = vmatpush1.bf16.msra.mxu1 %v2994_v49  ;;  %v3089_v49 = vld [vmem:[#allocation7 + $0x344] ss:$24 sps:$4 sm:$0xff]  }
 0x11a   :  { %2274 = vmatpush1.bf16.msra.mxu0 %v2997_v50  ;;  %2193 = vmatprep.subr.bf16.mxu1 %v3002_v51  ;;  %v3084_v50 = vld [vmem:[#allocation7 + $0x638] ss:$24 sps:$4 sm:$0xff]  }
 0x11b   :  { %2275 = vmatprep.subr.bf16.mxu0 %v3005_v52  ;;  %v3087_v51 = vld [vmem:[#allocation7 + $0x340] ss:$24 sps:$4 sm:$0xff]   ;;  %v3092_v52 = vld [vmem:[#allocation7 + $0x66c] ss:$24 sps:$4 sm:$0xff]  }
 0x11d   :  { %2194 = vmatpush1.bf16.msra.mxu1 %v3000_v53  ;;  %v3095_v53 = vld [vmem:[#allocation7 + $0x374] ss:$24 sps:$4 sm:$0xff]  }
 0x11e   :  { %2276 = vmatpush1.bf16.msra.mxu0 %v3003_v57  ;;  %2195 = vmatprep.subr.bf16.mxu1 %v3008_v58  ;;  %v3090_v57 = vld [vmem:[#allocation7 + $0x668] ss:$24 sps:$4 sm:$0xff]  }
 0x11f   :  { %2277 = vmatprep.subr.bf16.mxu0 %v3011_v55  ;;  %v3093_v58 = vld [vmem:[#allocation7 + $0x370] ss:$24 sps:$4 sm:$0xff]   ;;  %v3098_v55 = vld [vmem:[#allocation7 + $0x69c] ss:$24 sps:$4 sm:$0xff]  }
 0x121   :  { %2196 = vmatpush1.bf16.msra.mxu1 %v3006_v18  ;;  %v3096_v18 = vld [vmem:[#allocation7 + $0x698] ss:$24 sps:$4 sm:$0xff]  }
 0x122   :  { %2278 = vmatpush1.bf16.msra.mxu0 %v3009_v59  ;;  %2197 = vmatprep.subr.bf16.mxu1 %v3014_v62  ;;  %v3099_v59 = vld [vmem:[#allocation7 + $0x3a0] ss:$24 sps:$4 sm:$0xff]   ;;  %v3104_v62 = vld [vmem:[#allocation7 + $0x6cc] ss:$24 sps:$4 sm:$0xff]  }
 0x123   :  { %2279 = vmatprep.subr.bf16.mxu0 %v3017_v21  ;;  %v3107_v21 = vld [vmem:[#allocation7 + $0x3d4] ss:$24 sps:$4 sm:$0xff]  }
 0x125   :  { %2198 = vmatpush1.bf16.msra.mxu1 %v3012_v23  ;;  %v3105_v23 = vld [vmem:[#allocation7 + $0x3d0] ss:$24 sps:$4 sm:$0xff]  }
 0x126   :  { %2280 = vmatpush1.bf16.msra.mxu0 %v3015_v63  ;;  %2199 = vmatprep.subr.bf16.mxu1 %v3020_v0  ;;  %v3110_v63 = vld [vmem:[#allocation7 + $0x6fc] ss:$24 sps:$4 sm:$0xff]  }
 0x127   :  { %2281 = vmatprep.subr.bf16.mxu0 %v3023_v1  ;;  %v3113_v0 = vld [vmem:[#allocation7 + $0x404] ss:$24 sps:$4 sm:$0xff]   ;;  %v3108_v1 = vld [vmem:[#allocation7 + $0x6f8] ss:$24 sps:$4 sm:$0xff]  }
 0x129   :  { %2200 = vmatpush1.bf16.msra.mxu1 %v3018_v2  ;;  %v3111_v2 = vld [vmem:[#allocation7 + $0x400] ss:$24 sps:$4 sm:$0xff]  }
 0x12a   :  { %2282 = vmatpush1.bf16.msra.mxu0 %v3021_v3  ;;  %2201 = vmatprep.subr.bf16.mxu1 %v3026_v4  ;;  %v3116_v3 = vld [vmem:[#allocation7 + $0x72c] ss:$24 sps:$4 sm:$0xff]  }
 0x12b   :  { %2283 = vmatprep.subr.bf16.mxu0 %v3029_v5  ;;  %v3119_v4 = vld [vmem:[#allocation7 + $0x434] ss:$24 sps:$4 sm:$0xff]   ;;  %v3114_v5 = vld [vmem:[#allocation7 + $0x728] ss:$24 sps:$4 sm:$0xff]  }
 0x12d   :  { %2202 = vmatpush1.bf16.msra.mxu1 %v3024_v6  ;;  %v3117_v6 = vld [vmem:[#allocation7 + $0x430] ss:$24 sps:$4 sm:$0xff]  }
 0x12e   :  { %2284 = vmatpush1.bf16.msra.mxu0 %v3027_v8  ;;  %2203 = vmatprep.subr.bf16.mxu1 %v3032_v7  ;;  %v3122_v8 = vld [vmem:[#allocation7 + $0x75c] ss:$24 sps:$4 sm:$0xff]  }
 0x12f   :  { %2285 = vmatprep.subr.bf16.mxu0 %v3035_v20  ;;  %v3125_v7 = vld [vmem:[#allocation7 + $0x464] ss:$24 sps:$4 sm:$0xff]   ;;  %v3120_v20 = vld [vmem:[#allocation7 + $0x758] ss:$24 sps:$4 sm:$0xff]  }
 0x131   :  { %2204 = vmatpush1.bf16.msra.mxu1 %v3030_v9  ;;  %v3123_v9 = vld [vmem:[#allocation7 + $0x460] ss:$24 sps:$4 sm:$0xff]  }
 0x132   :  { %2286 = vmatpush1.bf16.msra.mxu0 %v3033_v19  ;;  %2205 = vmatprep.subr.bf16.mxu1 %v3038_v22  ;;  %v3128_v19 = vld [vmem:[#allocation7 + $0x78c] ss:$24 sps:$4 sm:$0xff]  }
 0x133   :  { %2287 = vmatprep.subr.bf16.mxu0 %v3041_v10  ;;  %v3131_v22 = vld [vmem:[#allocation7 + $0x494] ss:$24 sps:$4 sm:$0xff]   ;;  %v3126_v10 = vld [vmem:[#allocation7 + $0x788] ss:$24 sps:$4 sm:$0xff]  }
 0x135   :  { %2206 = vmatpush1.bf16.msra.mxu1 %v3036_v11  ;;  %v3129_v11 = vld [vmem:[#allocation7 + $0x490] ss:$24 sps:$4 sm:$0xff]  }
 0x136   :  { %2288 = vmatpush1.bf16.msra.mxu0 %v3039_v12  ;;  %2207 = vmatprep.subr.bf16.mxu1 %v3044_v13  ;;  %v3134_v12 = vld [vmem:[#allocation7 + $0x7bc] ss:$24 sps:$4 sm:$0xff]  }
 0x137   :  { %2289 = vmatprep.subr.bf16.mxu0 %v3047_v14  ;;  %v3137_v13 = vld [vmem:[#allocation7 + $0x4c4] ss:$24 sps:$4 sm:$0xff]   ;;  %v3132_v14 = vld [vmem:[#allocation7 + $0x7b8] ss:$24 sps:$4 sm:$0xff]  }
 0x139   :  { %2208 = vmatpush1.bf16.msra.mxu1 %v3042_v15  ;;  %v3135_v15 = vld [vmem:[#allocation7 + $0x4c0] ss:$24 sps:$4 sm:$0xff]  }
 0x13a   :  { %2290 = vmatpush1.bf16.msra.mxu0 %v3045_v16  ;;  %2209 = vmatprep.subr.bf16.mxu1 %v3050_v17  ;;  %v3140_v16 = vld [vmem:[#allocation7 + $0x7ec] ss:$24 sps:$4 sm:$0xff]  }
 0x13b   :  { %2291 = vmatprep.subr.bf16.mxu0 %v3053_v24  ;;  %v3143_v17 = vld [vmem:[#allocation7 + $0x4f4] ss:$24 sps:$4 sm:$0xff]   ;;  %v3138_v24 = vld [vmem:[#allocation7 + $0x7e8] ss:$24 sps:$4 sm:$0xff]  }
 0x13d   :  { %2210 = vmatpush1.bf16.msra.mxu1 %v3048_v25  ;;  %v3141_v25 = vld [vmem:[#allocation7 + $0x4f0] ss:$24 sps:$4 sm:$0xff]  }
 0x13e   :  { %2292 = vmatpush1.bf16.msra.mxu0 %v3051_v26  ;;  %2211 = vmatprep.subr.bf16.mxu1 %v3056_v27  ;;  %v3146_v26 = vld [vmem:[#allocation7 + $0x81c] ss:$24 sps:$4 sm:$0xff]  }
 0x13f   :  { %2293 = vmatprep.subr.bf16.mxu0 %v3059_v28  ;;  %v3149_v27 = vld [vmem:[#allocation7 + $0x524] ss:$24 sps:$4 sm:$0xff]   ;;  %v3144_v28 = vld [vmem:[#allocation7 + $0x818] ss:$24 sps:$4 sm:$0xff]  }
 0x141   :  { %2212 = vmatpush1.bf16.msra.mxu1 %v3054_v29  ;;  %v3147_v29 = vld [vmem:[#allocation7 + $0x520] ss:$24 sps:$4 sm:$0xff]  }
 0x142   :  { %2294 = vmatpush1.bf16.msra.mxu0 %v3057_v30  ;;  %2213 = vmatprep.subr.bf16.mxu1 %v3062_v31  ;;  %v3152_v30 = vld [vmem:[#allocation7 + $0x84c] ss:$24 sps:$4 sm:$0xff]  }
 0x143   :  { %2295 = vmatprep.subr.bf16.mxu0 %v3065_v32  ;;  %v3155_v31 = vld [vmem:[#allocation7 + $0x554] ss:$24 sps:$4 sm:$0xff]   ;;  %v3150_v32 = vld [vmem:[#allocation7 + $0x848] ss:$24 sps:$4 sm:$0xff]  }
 0x145   :  { %2214 = vmatpush1.bf16.msra.mxu1 %v3060_v33  ;;  %v3153_v33 = vld [vmem:[#allocation7 + $0x550] ss:$24 sps:$4 sm:$0xff]  }
 0x146   :  { %2296 = vmatpush1.bf16.msra.mxu0 %v3063_v34  ;;  %2215 = vmatprep.subr.bf16.mxu1 %v3068_v35  ;;  %v3158_v34 = vld [vmem:[#allocation7 + $0x87c] ss:$24 sps:$4 sm:$0xff]  }
 0x147   :  { %2297 = vmatprep.subr.bf16.mxu0 %v3071_v36  ;;  %v3161_v35 = vld [vmem:[#allocation7 + $0x584] ss:$24 sps:$4 sm:$0xff]   ;;  %v3156_v36 = vld [vmem:[#allocation7 + $0x878] ss:$24 sps:$4 sm:$0xff]  }
 0x149   :  { %2216 = vmatpush1.bf16.msra.mxu1 %v3066_v37  ;;  %v3159_v37 = vld [vmem:[#allocation7 + $0x580] ss:$24 sps:$4 sm:$0xff]  }
 0x14a   :  { %2298 = vmatpush1.bf16.msra.mxu0 %v3069_v38  ;;  %2217 = vmatprep.subr.bf16.mxu1 %v3074_v39  ;;  %v3164_v38 = vld [vmem:[#allocation7 + $0x8ac] ss:$24 sps:$4 sm:$0xff]  }
 0x14b   :  { %2299 = vmatprep.subr.bf16.mxu0 %v3077_v40  ;;  %v3167_v39 = vld [vmem:[#allocation7 + $0x5b4] ss:$24 sps:$4 sm:$0xff]   ;;  %v3162_v40 = vld [vmem:[#allocation7 + $0x8a8] ss:$24 sps:$4 sm:$0xff]  }
 0x14d   :  { %2218 = vmatpush1.bf16.msra.mxu1 %v3072_v42  ;;  %v3165_v42 = vld [vmem:[#allocation7 + $0x5b0] ss:$24 sps:$4 sm:$0xff]  }
 0x14e   :  { %2300 = vmatpush1.bf16.msra.mxu0 %v3075_v43  ;;  %2228 = vmatprep.subr.bf16.mxu1 %v3080_v44  ;;  %v3170_v43 = vld [vmem:[#allocation7 + $0x8dc] ss:$24 sps:$4 sm:$0xff]  }
 0x14f   :  { %2310 = vmatprep.subr.bf16.mxu0 %v3083_v45  ;;  %v3173_v44 = vld [vmem:[#allocation7 + $0x5e4] ss:$24 sps:$4 sm:$0xff]   ;;  %v3168_v45 = vld [vmem:[#allocation7 + $0x8d8] ss:$24 sps:$4 sm:$0xff]  }
 0x150   :  { %2220 = vmatmul.mubr.bf16.vlgmr.msra.gmra.mrb[4].mxu1 %v3447_v61 }
 0x151   :  { %2302 = vmatmul.mubr.bf16.vlgmr.msra.gmra.mrb[4].mxu0 %v3445_v60  ;;  %2229 = vmatpush1.bf16.msra.mxu1 %v3078_v46  ;;  %v3101_v60 = vld [vmem:[#allocation7 + $0x3a4] ss:$24 sps:$4 sm:$0xff]   ;;  %v3171_v46 = vld [vmem:[#allocation7 + $0x5e0] ss:$24 sps:$4 sm:$0xff]  }
 0x152   :  { %2260 = vmatprep.mubr.bf16.mxu1 %v3465_v54  ;;  %2311 = vmatpush1.bf16.msra.mxu0 %v3081_v47  ;;  %v3176_v47 = vld [vmem:[#allocation7 + $0x614] ss:$24 sps:$4 sm:$0xff]  }
 0x153   :  { %2342 = vmatprep.mubr.bf16.mxu0 %v3441_v56  ;;  %2230 = vmatprep.subr.bf16.mxu1 %v3086_v48  ;;  %v3102_v56 = vld [vmem:[#allocation7 + $0x6c8] ss:$24 sps:$4 sm:$0xff]  }
 0x154   :  { %2312 = vmatprep.subr.bf16.mxu0 %v3089_v49  ;;  %v3174_v48 = vld [vmem:[#allocation7 + $0x610] ss:$24 sps:$4 sm:$0xff]   ;;  %v3179_v49 = vld [vmem:[#allocation7 + $0x644] ss:$24 sps:$4 sm:$0xff]  }
 0x155   :  { %2231 = vmatpush1.bf16.msra.mxu1 %v3084_v50  ;;  %v3177_v50 = vld [vmem:[#allocation7 + $0x640] ss:$24 sps:$4 sm:$0xff]  }
 0x156   :  { %2313 = vmatpush1.bf16.msra.mxu0 %v3087_v51  ;;  %2232 = vmatprep.subr.bf16.mxu1 %v3092_v52  ;;  %v3182_v51 = vld [vmem:[#allocation7 + $0x674] ss:$24 sps:$4 sm:$0xff]   ;;  %v3180_v52 = vld [vmem:[#allocation7 + $0x670] ss:$24 sps:$4 sm:$0xff]  }
 0x157   :  { %2314 = vmatprep.subr.bf16.mxu0 %v3095_v53  ;;  %v3185_v53 = vld [vmem:[#allocation7 + $0x6a4] ss:$24 sps:$4 sm:$0xff]  }
 0x159   :  { %2233 = vmatpush1.bf16.msra.mxu1 %v3090_v57  ;;  %v3183_v57 = vld [vmem:[#allocation7 + $0x6a0] ss:$24 sps:$4 sm:$0xff]  }
 0x15a   :  { %2315 = vmatpush1.bf16.msra.mxu0 %v3093_v58  ;;  %2234 = vmatprep.subr.bf16.mxu1 %v3098_v55  ;;  %v3188_v58 = vld [vmem:[#allocation7 + $0x6d4] ss:$24 sps:$4 sm:$0xff]   ;;  %v3186_v55 = vld [vmem:[#allocation7 + $0x6d0] ss:$24 sps:$4 sm:$0xff]  }
 0x15b   :  { %2316 = vmatprep.subr.bf16.mxu0 %v3101_v60  ;;  %v3191_v60 = vld [vmem:[#allocation7 + $0x704] ss:$24 sps:$4 sm:$0xff]  }
 0x15d   :  { %2235 = vmatpush1.bf16.msra.mxu1 %v3096_v18 }
 0x15e   :  { %2317 = vmatpush1.bf16.msra.mxu0 %v3099_v59  ;;  %2236 = vmatprep.subr.bf16.mxu1 %v3104_v62 }
 0x15f   :  { %2318 = vmatprep.subr.bf16.mxu0 %v3107_v21 }
 0x161   :  { %2237 = vmatpush1.bf16.msra.mxu1 %v3102_v56  ;;  %v3192_v56 = vld [vmem:[#allocation7 + $0x730] ss:$24 sps:$4 sm:$0xff]  }
 0x162   :  { %2319 = vmatpush1.bf16.msra.mxu0 %v3105_v23  ;;  %2238 = vmatprep.subr.bf16.mxu1 %v3110_v63  ;;  %v3197_v23 = vld [vmem:[#allocation7 + $0x764] ss:$24 sps:$4 sm:$0xff]   ;;  %v3195_v63 = vld [vmem:[#allocation7 + $0x760] ss:$24 sps:$4 sm:$0xff]  }
 0x163   :  { %2320 = vmatprep.subr.bf16.mxu0 %v3113_v0  ;;  %v3200_v0 = vld [vmem:[#allocation7 + $0x794] ss:$24 sps:$4 sm:$0xff]  }
 0x165   :  { %2239 = vmatpush1.bf16.msra.mxu1 %v3108_v1  ;;  %v3198_v1 = vld [vmem:[#allocation7 + $0x790] ss:$24 sps:$4 sm:$0xff]  }
 0x166   :  { %2321 = vmatpush1.bf16.msra.mxu0 %v3111_v2  ;;  %2240 = vmatprep.subr.bf16.mxu1 %v3116_v3  ;;  %v3203_v2 = vld [vmem:[#allocation7 + $0x7c4] ss:$24 sps:$4 sm:$0xff]   ;;  %v3201_v3 = vld [vmem:[#allocation7 + $0x7c0] ss:$24 sps:$4 sm:$0xff]  }
 0x167   :  { %2322 = vmatprep.subr.bf16.mxu0 %v3119_v4  ;;  %v3206_v4 = vld [vmem:[#allocation7 + $0x7f4] ss:$24 sps:$4 sm:$0xff]  }
 0x169   :  { %2241 = vmatpush1.bf16.msra.mxu1 %v3114_v5  ;;  %v3204_v5 = vld [vmem:[#allocation7 + $0x7f0] ss:$24 sps:$4 sm:$0xff]  }
 0x16a   :  { %2323 = vmatpush1.bf16.msra.mxu0 %v3117_v6  ;;  %2242 = vmatprep.subr.bf16.mxu1 %v3122_v8  ;;  %v3209_v6 = vld [vmem:[#allocation7 + $0x824] ss:$24 sps:$4 sm:$0xff]   ;;  %v3207_v8 = vld [vmem:[#allocation7 + $0x820] ss:$24 sps:$4 sm:$0xff]  }
 0x16b   :  { %2324 = vmatprep.subr.bf16.mxu0 %v3125_v7  ;;  %v3212_v7 = vld [vmem:[#allocation7 + $0x854] ss:$24 sps:$4 sm:$0xff]  }
 0x16d   :  { %2243 = vmatpush1.bf16.msra.mxu1 %v3120_v20  ;;  %v3210_v20 = vld [vmem:[#allocation7 + $0x850] ss:$24 sps:$4 sm:$0xff]  }
 0x16e   :  { %2325 = vmatpush1.bf16.msra.mxu0 %v3123_v9  ;;  %2244 = vmatprep.subr.bf16.mxu1 %v3128_v19  ;;  %v3215_v9 = vld [vmem:[#allocation7 + $0x884] ss:$24 sps:$4 sm:$0xff]   ;;  %v3213_v19 = vld [vmem:[#allocation7 + $0x880] ss:$24 sps:$4 sm:$0xff]  }
 0x16f   :  { %2326 = vmatprep.subr.bf16.mxu0 %v3131_v22  ;;  %v3218_v22 = vld [vmem:[#allocation7 + $0x8b4] ss:$24 sps:$4 sm:$0xff]  }
 0x171   :  { %2245 = vmatpush1.bf16.msra.mxu1 %v3126_v10  ;;  %v3216_v10 = vld [vmem:[#allocation7 + $0x8b0] ss:$24 sps:$4 sm:$0xff]  }
 0x172   :  { %2327 = vmatpush1.bf16.msra.mxu0 %v3129_v11  ;;  %2246 = vmatprep.subr.bf16.mxu1 %v3134_v12  ;;  %v3221_v11 = vld [vmem:[#allocation7 + $0x8e4] ss:$24 sps:$4 sm:$0xff]   ;;  %v3219_v12 = vld [vmem:[#allocation7 + $0x8e0] ss:$24 sps:$4 sm:$0xff]  }
 0x173   :  { %2328 = vmatprep.subr.bf16.mxu0 %v3137_v13  ;;  %v486_v13 = vlaneseq }
 0x175   :  { %2247 = vmatpush1.bf16.msra.mxu1 %v3132_v14  ;;  %v487_v14 = vshrl.u32 %v486_v13, 7 }
 0x176   :  { %2329 = vmatpush1.bf16.msra.mxu0 %v3135_v15  ;;  %2248 = vmatprep.subr.bf16.mxu1 %v3140_v16  ;;  %v481_v15 = vld [vmem:[#allocation9] sm:$0x3f] }
 0x177   :  { %2330 = vmatprep.subr.bf16.mxu0 %v3143_v17  ;;  %v482_v16 = vunpack.c.l.bf16 %v481_v15  ;;  %v488_v17 = vsub.s32 0, %v487_v14 }
 0x179   :  { %2249 = vmatpush1.bf16.msra.mxu1 %v3138_v24  ;;  %v492_v24 = vsub.s32 2, %v487_v14 }
 0x17a   :  { %2331 = vmatpush1.bf16.msra.mxu0 %v3141_v25  ;;  %2250 = vmatprep.subr.bf16.mxu1 %v3146_v26  ;;  %v489_v25 = vrot.slane %v482_v16, %v488_v17 }
 0x17b   :  { %2332 = vmatprep.subr.bf16.mxu0 %v3149_v27  ;;  %v493_v26 = vrot.slane %v482_v16, %v492_v24 }
 0x17c   :  { %v519_v27 = vrot.slane %v489_v25, %v488_v17 }
 0x17d   :  { %2251 = vmatpush1.bf16.msra.mxu1 %v3144_v28  ;;  %v523_v28 = vrot.slane %v493_v26, %v488_v17 }
 0x17e   :  { %2333 = vmatpush1.bf16.msra.mxu0 %v3147_v29  ;;  %2252 = vmatprep.subr.bf16.mxu1 %v3152_v30 }
 0x17f   :  { %2334 = vmatprep.subr.bf16.mxu0 %v3155_v31 }
 0x181   :  { %2253 = vmatpush1.bf16.msra.mxu1 %v3150_v32 }
 0x182   :  { %2335 = vmatpush1.bf16.msra.mxu0 %v3153_v33  ;;  %2254 = vmatprep.subr.bf16.mxu1 %v3158_v34 }
 0x183   :  { %2336 = vmatprep.subr.bf16.mxu0 %v3161_v35 }
 0x185   :  { %2255 = vmatpush1.bf16.msra.mxu1 %v3156_v36 }
 0x186   :  { %2337 = vmatpush1.bf16.msra.mxu0 %v3159_v37  ;;  %2256 = vmatprep.subr.bf16.mxu1 %v3164_v38  ;;  %v496_v38 = vsub.s32 4, %v487_v14 }
 0x187   :  { %2338 = vmatprep.subr.bf16.mxu0 %v3167_v39 }
 0x188   :  { %v497_v39 = vrot.slane %v482_v16, %v496_v38 }
 0x189   :  { %2257 = vmatpush1.bf16.msra.mxu1 %v3162_v40  ;;  %v3322_v40 = vmov 1966171168  }
 0x18a   :  { %2339 = vmatpush1.bf16.msra.mxu0 %v3165_v42  ;;  %2258 = vmatprep.subr.bf16.mxu1 %v3170_v43  ;;  %v2408_v42 = vunpack.c.l.s4 %v3322_v40 }
 0x18b   :  { %2340 = vmatprep.subr.bf16.mxu0 %v3173_v44  ;;  %v527_v44 = vrot.slane %v497_v39, %v488_v17 }
 0x18d   :  { %2259 = vmatpush1.bf16.msra.mxu1 %v3168_v45  ;;  %v2409_v45 = vunpack.c.0.s8 %v2408_v42 }
 0x18e   :  { %2341 = vmatpush1.bf16.msra.mxu0 %v3171_v46 }
 0x18f   :  { %2351 = vmatprep.subr.bf16.mxu0 %v3176_v47 }
 0x190   :  { %2261 = vmatmul.mubr.bf16.vlgmr.msra.gmra.mrb[4].mxu1 %v3473_v41 }
 0x191   :  { %2343 = vmatmul.mubr.bf16.vlgmr.msra.gmra.mrb[4].mxu0 %v3447_v61  ;;  %v3189_v61 = vld [vmem:[#allocation7 + $0x700] ss:$24 sps:$4 sm:$0xff]  }
 0x192   :  { %2352 = vmatpush1.bf16.msra.mxu0 %v3174_v48  ;;  %2383 = vmatprep.mubr.bf16.mxu0 %v3465_v54  ;;  %v3194_v54 = vld [vmem:[#allocation7 + $0x734] ss:$24 sps:$4 sm:$0xff]  }
 0x193   :  { %2353 = vmatprep.subr.bf16.mxu0 %v3179_v49 }
 0x196   :  { %2354 = vmatpush1.bf16.msra.mxu0 %v3177_v50  ;;  %v2412_v50 = vsub.s32 %v2409_v45, %v487_v14 }
 0x197   :  { %2355 = vmatprep.subr.bf16.mxu0 %v3182_v51 }
 0x19a   :  { %2356 = vmatpush1.bf16.msra.mxu0 %v3180_v52 }
 0x19b   :  { %2357 = vmatprep.subr.bf16.mxu0 %v3185_v53 }
 0x19e   :  { %2358 = vmatpush1.bf16.msra.mxu0 %v3183_v57 }
 0x19f   :  { %2359 = vmatprep.subr.bf16.mxu0 %v3188_v58 }
 0x1a2   :  { %2360 = vmatpush1.bf16.msra.mxu0 %v3186_v55 }
 0x1a3   :  { %v2057_v18 = vpop.f32.mrb[0].mxu1  ;;  %2361 = vmatprep.subr.bf16.mxu0 %v3191_v60 }
 0x1a4   :  { %v2059_v59 = vpop.f32.mrb[1].mxu1  ;;  %v2058_v29 = vadd.f32 %v2057_v18, %v519_v27 }
 0x1a5   :  { %v2061_v62 = vpop.f32.mrb[2].mxu1  ;;  %v2060_v30 = vadd.f32 %v2059_v59, %v523_v28 }
 0x1a6   :  { %2362 = vmatpush1.bf16.msra.mxu0 %v3189_v61  ;;  %v2062_v21 = vpop.f32.mrb[3].mxu1  ;;  %v483_v61 = vunpack.c.h.bf16 %v481_v15 }
 0x1a7   :  { %2363 = vmatprep.subr.bf16.mxu0 %v3194_v54 }
 0x1a8   :  { %v505_v18 = vrot.slane %v483_v61, %v488_v17  ;;  %v509_v54 = vrot.slane %v483_v61, %v492_v24 }
 0x1aa   :  { %2364 = vmatpush1.bf16.msra.mxu0 %v3192_v56  ;;  %v535_v59 = vrot.slane %v505_v18, %v488_v17  ;;  %v539_v62 = vrot.slane %v509_v54, %v488_v17 }
 0x1ab   :  { %2365 = vmatprep.subr.bf16.mxu0 %v3197_v23 }
 0x1ae   :  { %2366 = vmatpush1.bf16.msra.mxu0 %v3195_v63 }
 0x1af   :  { %2367 = vmatprep.subr.bf16.mxu0 %v3200_v0 }
 0x1b2   :  { %2368 = vmatpush1.bf16.msra.mxu0 %v3198_v1 }
 0x1b3   :  { %2369 = vmatprep.subr.bf16.mxu0 %v3203_v2 }
 0x1b6   :  { %2370 = vmatpush1.bf16.msra.mxu0 %v3201_v3 }
 0x1b7   :  { %2371 = vmatprep.subr.bf16.mxu0 %v3206_v4 }
 0x1ba   :  { %2372 = vmatpush1.bf16.msra.mxu0 %v3204_v5 }
 0x1bb   :  { %2373 = vmatprep.subr.bf16.mxu0 %v3209_v6 }
 0x1be   :  { %2374 = vmatpush1.bf16.msra.mxu0 %v3207_v8 }
 0x1bf   :  { %2375 = vmatprep.subr.bf16.mxu0 %v3212_v7 }
 0x1c2   :  { %2376 = vmatpush1.bf16.msra.mxu0 %v3210_v20 }
 0x1c3   :  { %2377 = vmatprep.subr.bf16.mxu0 %v3215_v9 }
 0x1c6   :  { %2378 = vmatpush1.bf16.msra.mxu0 %v3213_v19 }
 0x1c7   :  { %2379 = vmatprep.subr.bf16.mxu0 %v3218_v22 }
 0x1ca   :  { %2380 = vmatpush1.bf16.msra.mxu0 %v3216_v10 }
 0x1cb   :  { %2381 = vmatprep.subr.bf16.mxu0 %v3221_v11 }
 0x1ce   :  { %2382 = vmatpush1.bf16.msra.mxu0 %v3219_v12 }
 0x1d1   :  { %2384 = vmatmul.mubr.bf16.vlgmr.msra.gmra.mrb[4].mxu0 %v3473_v41  ;;  %v500_v41 = vsub.s32 6, %v487_v14 }
 0x1d3   :  { %v501_v43 = vrot.slane %v482_v16, %v500_v41 }
 0x1d5   :  { %v531_v46 = vrot.slane %v501_v43, %v488_v17 }
 0x1e3   :  { %v2139_v31 = vpop.f32.mrb[0].mxu0 }
 0x1e4   :  { %v2754_v32 = vadd.f32 %v2139_v31, %v2058_v29  ;;  %v2141_v33 = vpop.f32.mrb[1].mxu0 }
 0x1e5   :  { %v2756_v34 = vadd.f32 %v2141_v33, %v2060_v30  ;;  %v2143_v35 = vpop.f32.mrb[2].mxu0 }
 0x1e6   :  { %v2144_v36 = vpop.f32.mrb[3].mxu0 }
 0x1e7   :  { %v2750_v37 = vpack.c.bf16 %v2756_v34, %v2754_v32 }
 0x1e9   :  { %v2413_v58 = vrot.slane %v2750_v37, %v2412_v50 }
 0x263   :  { %v2262_v47 = vpop.f32.mrb[4].mxu1 }
 0x264   :  { %v2757_v48 = vadd.f32 %v2262_v47, %v527_v44  ;;  %v2264_v49 = vpop.f32.mrb[5].mxu1 }
 0x265   :  { %v2758_v51 = vadd.f32 %v2264_v49, %v531_v46  ;;  %v2266_v52 = vpop.f32.mrb[6].mxu1 }
 0x266   :  { %v2267_v53 = vpop.f32.mrb[7].mxu1 }
 0x267   :  { %v2751_v57 = vpack.c.bf16 %v2758_v51, %v2757_v48 }
 0x269   :  { %v2420_v55 = vrot.slane %v2751_v57, %v2412_v50 }
 0x26b   :  { %v2428_v60 = vcombine.low %v2413_v58, %v2420_v55 }
 0x26d   :  { %v2435_v4 = vrot.slane %v2428_v60, %v2412_v50 }
 0x2a4   :  { %v2385_v21 = vpop.f32.mrb[4].mxu0 }
 0x2a5   :  { %v2759_v56 = vadd.f32 %v2385_v21, %v535_v59  ;;  %v2387_v23 = vpop.f32.mrb[5].mxu0 }
 0x2a6   :  { %v2760_v63 = vadd.f32 %v2387_v23, %v539_v62  ;;  %v2389_v0 = vpop.f32.mrb[6].mxu0 }
 0x2a7   :  { %v2390_v1 = vpop.f32.mrb[7].mxu0 }
 0x2a8   :  { %v2752_v2 = vpack.c.bf16 %v2760_v63, %v2759_v56 }
 0x2aa   :  { %v2427_v3 = vrot.slane %v2752_v2, %v2412_v50 }
 0x2ac   :  { %v2442_v5 = vrot.slane %v2427_v3, %v2412_v50 }
 0x2ae   :  { %v2443_v6 = vcombine.low %v2435_v4, %v2442_v5 }
 0x2b0   :  { %2445 = vst [vmem:[#allocation10] sm:$0x3f] %v2443_v6 }
 0x2b1   :  { %3299 = shalt.err (!%p3296_p0)
}
 0x2b2   :  { %s3300_s10 = scalar_lea.hbm %s3504_s5, 96 }
 0x2b3   :  { %p3301_p1 = scmp.ne.s32.totalorder %s3504_s5, %s3300_s10  ;;  %p3304_p2 = scmp.lt.u32.totalorder %s3300_s10, %s3504_s5 }
 0x2b5   :  { %p3306_p3 = pnand %p3304_p2, %p3301_p1 }
 0x2b7   :  { %3309 = shalt.err (!%p3306_p3)
}
 0x2b8   :  { %2455 = dma.vmem_to_hbm [thread:$0]  %s2453_s6, 96, %s3504_s5, [#allocation6]  }
 0x2b9   :  { %3314 = dma.done.wait [#allocation6], 96  }
 0x2ba   :  { %3315 = vsyncadd [#allocation6], 4294967200 }
 0x2bb   :  { %2459 = vsyncpa [#allocation5], 1 }
 0x2bc   :  { %2460 = vsyncpa [#allocation8], 1 }
 0x2bd   :  { %2461 = vsyncpa [#allocation6], 1 }

</bundles_post_ra>
